<compile_context>
chip_gen: v7x
topology: tpu7x:2x2x1
jax: 0.10.0
libtpu: 0.0.40
codegen_flags: <defaults>
</compile_context>

<pallas_src>
import functools

import jax
import jax.numpy as jnp
from jax.experimental import pallas as pl
from jax.experimental.pallas import tpu as pltpu  # noqa: F401  (TPU backend)

# ------------------------------------------------------------------ config ---
B = 2                 # batch
MAX_SERIES = 5        # max_series_blocks
MAX_CONT = 32         # max_cont_blocks
EMB_DIM1 = 8          # emb_dim1
EMB_LEN1 = 4          # emb_len1 (latent sequence length)
HIDDEN = 32           # encoder hidden width
NUM_CHART_HEADS = 6   # len(UNIQ_CHART_HEADS)
CODEBOOK_K = 128      # vq_layer1 codebook size
VOCAB = 16            # row/col logit vocabulary
SCALE_DIM = 4         # per-series scale prediction dim
VQ_BETA = 0.25

# ---------------------------------------------------------------- derived ----
IN_FEAT = MAX_SERIES * MAX_CONT            # 160  flattened chart data
ENC_W = EMB_LEN1 * HIDDEN                  # 128  all encoder tokens on lanes
LAT_W = EMB_LEN1 * EMB_DIM1                # 32   all quantized latents on lanes
ROW_W = MAX_SERIES * VOCAB                 # 80
COL_W = MAX_CONT * VOCAB                   # 512
SCALE_W = MAX_SERIES * SCALE_DIM           # 20
CONT_W = MAX_SERIES * MAX_CONT             # 160
# 128-aligned head slab layout (NPAD = 1024 = 4 full 256-wide MXU passes)
ROW_OFF = 0                                # row logits  [0, 80)    (pad to 128)
COL_OFF = 128                              # col logits  [128, 640)
RC_PAD = COL_OFF + COL_W                   # 640  softmaxed region
SCALE_OFF = RC_PAD                         # scale preds [640, 660) (pad to 768)
CONT_OFF = 768                             # cont logits [768, 928)
IDX_OFF = CONT_OFF + CONT_W                # 928  packed codebook indices (4)
LOSS_OFF = IDX_OFF + EMB_LEN1              # 932  packed vq-loss scalar
NPAD = 1024


# ------------------------------------------------------- fused Pallas kernel --
def _fused_forward_kernel(x_ref, ct_ref, w_enc_ref, b_enc_ref,
                          w_proj_ref, b_proj_ref, cbt_ref, cb_ref, esq_ref,
                          ct_emb_ref, w_hc_ref, w_hq_ref, b_head_ref, g_ref,
                          out_ref, *, inv_temp):
    """Whole BaseDataModel forward hot path, batch-major, one output store."""
    f32 = jnp.float32
    bf16 = jnp.bfloat16

    # --- run_encoder (enc_conv surrogate): ONE (B,160)x(160,128) matmul + relu.
    # Token l occupies lanes [32l, 32(l+1)) of the result.
    x16 = x_ref[...].astype(bf16)
    enc = jnp.dot(x16, w_enc_ref[...], preferred_element_type=f32) + b_enc_ref[...]
    enc = jnp.maximum(enc, 0.0)                                   # (B, 128)

    # --- enc_proj1 (block-diagonal per-token projection) ----------------------
    # Token l's latent lands in lanes [8l, 8(l+1)).
    y1 = jnp.dot(enc, w_proj_ref[...], preferred_element_type=f32) + b_proj_ref[...]
    #                                                               (B, 32)

    # --- vq_layer1: per-token distances / argmin / gather / loss --------------
    # dist(token l) = ||e||^2 - 2 y_l.e  (the ||y||^2 term is constant per token
    # row and does not affect argmin).  Block-diagonal codebook^T makes the
    # result (B, 4*128) with each token's 128 distances vreg-aligned.
    cross = jnp.dot(y1, cbt_ref[...], preferred_element_type=f32)  # (B, 512)
    d = esq_ref[...] - 2.0 * cross
    local_lane = jax.lax.broadcasted_iota(jnp.int32, (B, CODEBOOK_K), 1)
    oh_parts, idx_cols = [], []
    for l in range(EMB_LEN1):
        dl = d[:, l * CODEBOOK_K:(l + 1) * CODEBOOK_K]             # aligned slice
        ml = jnp.min(dl, axis=-1, keepdims=True)
        il = jnp.min(jnp.where(dl <= ml, local_lane, CODEBOOK_K),
                     axis=-1, keepdims=True)                       # (B,1) first-min
        idx_cols.append(il)
        oh_parts.append((local_lane == il).astype(f32))            # (B,128)
    onehot = jnp.concatenate(oh_parts, axis=-1)                    # (B, 512)
    q = jnp.dot(onehot, cb_ref[...], preferred_element_type=f32)   # (B, 32)
    diff = q - y1
    sse = jnp.sum(jnp.sum(diff * diff, axis=-1, keepdims=True), axis=0,
                  keepdims=True)                                   # (1,1)
    # codebook + commitment loss (forward value only).
    # TODO(synk): straight-through / stop-gradient backward semantics omitted.
    vq_loss = (1.0 + VQ_BETA) * sse / float(B * LAT_W)             # (1,1)

    # --- get_chart_type_emb: in-kernel one-hot lookup --------------------------
    hiota = jax.lax.broadcasted_iota(jnp.int32, (B, NUM_CHART_HEADS), 1)
    ct_onehot = (hiota == ct_ref[...]).astype(f32)                 # (B, 6)
    cond = jnp.dot(ct_onehot, ct_emb_ref[...], preferred_element_type=f32)  # (B,8)

    # --- fused decoder heads: [cond | q] @ W without assembling [cond | q] ----
    heads = (jnp.dot(cond.astype(bf16), w_hc_ref[...], preferred_element_type=f32)
             + jnp.dot(q.astype(bf16), w_hq_ref[...], preferred_element_type=f32)
             + b_head_ref[...])                                    # (B, 1024)

    # --- reconstruct_tab_shape: softmax(logits / temp) per 16-wide vocab group.
    # Row-global max is the stabilizer (exact softmax whenever no underflow);
    # the per-group denominators come from ONE dense block-diagonal group-
    # membership matmul; the clamped exact division avoids Inf/NaN even if a
    # whole group underflows at extreme inv_temp.
    rc = heads[:, 0:RC_PAD] * inv_temp
    m = jnp.max(rc, axis=-1, keepdims=True)
    ex = jnp.exp(rc - m)
    denom = jnp.dot(ex.astype(bf16), g_ref[...], preferred_element_type=f32)
    rc_probs = ex / jnp.maximum(denom, 1e-30)                      # (B, 640)

    scale_blk = heads[:, SCALE_OFF:CONT_OFF]                       # (B, 128) raw
    tail = jax.nn.sigmoid(heads[:, CONT_OFF:NPAD])                 # (B, 256)
    rel = jax.lax.broadcasted_iota(jnp.int32, (B, NPAD - CONT_OFF), 1)
    tail = jnp.where(rel < CONT_W, tail, 0.0)
    # pack codebook indices + vq loss into the otherwise-unused pad lanes
    for l in range(EMB_LEN1):
        tail = jnp.where(rel == CONT_W + l, idx_cols[l].astype(f32), tail)
    tail = jnp.where(rel == CONT_W + EMB_LEN1, vq_loss, tail)

    # single lane-dense (128-aligned concat) store of the full output row
    out_ref[...] = jnp.concatenate([rc_probs, scale_blk, tail], axis=-1)


def _fused_forward(params, x_flat, ct_idx2d, temp):
    f32 = jnp.float32
    # Block-diagonal / transposed forms derived from the single codebook /
    # projection parameters at the call site (single source of truth).
    cb = params["codebook"]                                        # (K, D)
    eye = jnp.eye(EMB_LEN1, dtype=f32)
    cbt_bd = jnp.kron(eye, cb.T)                                   # (32, 512)
    cb_bd = jnp.kron(eye, cb)                                      # (512, 32)
    esq = jnp.tile(jnp.sum(cb * cb, axis=1), (EMB_LEN1,))[None, :]  # (1, 512)
    w_proj_bd = jnp.kron(eye, params["w_proj1"])                   # (128, 32)
    b_proj = jnp.tile(params["b_proj1"], (1, EMB_LEN1))            # (1, 32)

    kernel = functools.partial(_fused_forward_kernel, inv_temp=1.0 / float(temp))
    # No grid: every operand is whole-array VMEM-resident (total < 2 MiB), no
    # pipeline double-buffering, no prologue/epilogue bookkeeping.
    return pl.pallas_call(
        kernel,
        out_shape=jax.ShapeDtypeStruct((B, NPAD), f32),
    )(x_flat, ct_idx2d,
      params["w_enc"], params["b_enc"],
      w_proj_bd, b_proj, cbt_bd, cb_bd, esq,
      params["ct_emb"],
      params["w_head_cond"], params["w_head_lat"], params["b_heads"],
      params["g_grp"])


# ----------------------------------------------------------- parameter init ---
Y_FEAT = EMB_DIM1 + LAT_W     # 40   [cond | latents] decoder-input feature dim


def init_params(key):
    ks = jax.random.split(key, 8)
    n = lambda k, s: (0.02 * jax.random.normal(k, s)).astype(jnp.float32)

    def padc(w, width):
        return jnp.concatenate(
            [w, jnp.zeros((w.shape[0], width - w.shape[1]), jnp.float32)], axis=1)

    # Fused decoder-head weight with 128-aligned head starts:
    #   [row|pad | col | scale|pad | cont|pad]  -> (40, 1024)
    w_heads = jnp.concatenate([
        padc(n(ks[4], (Y_FEAT, ROW_W)), 128),
        n(ks[5], (Y_FEAT, COL_W)),
        padc(n(ks[6], (Y_FEAT, SCALE_W)), 128),
        padc(n(ks[7], (Y_FEAT, CONT_W)), 256),
    ], axis=1)

    # Block-diagonal vocab-group membership matrix for the fused per-group
    # softmax denominators (640x640, exactly representable 0/1 values in bf16).
    k = jnp.arange(RC_PAD)
    grp = jnp.where(k < ROW_W, k // VOCAB,
                    jnp.where(k < COL_OFF, MAX_SERIES,
                              MAX_SERIES + 1 + (k - COL_OFF) // VOCAB))
    g_grp = (grp[:, None] == grp[None, :]).astype(jnp.bfloat16)

    return {
        "w_enc": n(ks[0], (IN_FEAT, ENC_W)).astype(jnp.bfloat16),  # enc_conv surrogate
        "b_enc": jnp.zeros((1, ENC_W), jnp.float32),
        "w_proj1": n(ks[1], (HIDDEN, EMB_DIM1)),                   # enc_proj1
        "b_proj1": jnp.zeros((1, EMB_DIM1), jnp.float32),
        "codebook": n(ks[2], (CODEBOOK_K, EMB_DIM1)),              # vq_layer1 (K, D)
        "ct_emb": n(ks[3], (NUM_CHART_HEADS, EMB_DIM1)),           # nn.Embedding weight
        "w_head_cond": w_heads[:EMB_DIM1].astype(jnp.bfloat16),    # (8, 1024)
        "w_head_lat": w_heads[EMB_DIM1:].astype(jnp.bfloat16),     # (32, 1024)
        "b_heads": jnp.zeros((1, NPAD), jnp.float32),
        "g_grp": g_grp,                                            # (640, 640) bf16
    }


# --------------------------------------------------------------- forward ------
def _tab_count(sample):
    # Exact vectorization of the row/col counting loop in reconstruct_tab_shape:
    #   stop *= s_i ; count += stop * s_i   ==   sum(cumprod(s) * s)
    # (Faithful to the torch reference; as in the reference it is only a true
    #  "count" for 0/1-valued samples and can overflow for long non-zero runs.)
    stop = jnp.cumprod(sample, axis=1)
    cnt = jnp.sum(stop * sample, axis=1)
    return jnp.where(cnt == 0, jnp.ones_like(cnt), cnt)


def forward(params, x_cont, ct_idx, key, temp=1.0):
    """BaseDataModel.forward(is_train=True) simplified hot path."""
    bsz = x_cont.shape[0]
    x_flat = x_cont.reshape(bsz, IN_FEAT)
    ct2d = ct_idx.reshape(bsz, 1).astype(jnp.int32)

    slab = _fused_forward(params, x_flat, ct2d, temp)

    # decode the lane-dense slab (all slices 128-aligned or trailing) ----------
    row_probs = slab[:, ROW_OFF:ROW_OFF + ROW_W].reshape(bsz, MAX_SERIES, VOCAB)
    col_probs = slab[:, COL_OFF:COL_OFF + COL_W].reshape(bsz, MAX_CONT, VOCAB)
    scale_preds = slab[:, SCALE_OFF:SCALE_OFF + SCALE_W].reshape(bsz, MAX_SERIES, SCALE_DIM)
    cont_preds = slab[:, CONT_OFF:CONT_OFF + CONT_W].reshape(bsz, MAX_SERIES, MAX_CONT)
    cb_ind1 = jnp.round(slab[:, IDX_OFF:IDX_OFF + EMB_LEN1]).astype(jnp.int32)
    cb_loss1 = slab[0, LOSS_OFF]

    # --- reconstruct_tab_shape sampling + counting (plain JAX) ----------------
    k1, k2 = jax.random.split(key)
    row_sample = jax.random.categorical(k1, jnp.log(row_probs + 1e-20), axis=-1)
    col_sample = jax.random.categorical(k2, jnp.log(col_probs + 1e-20), axis=-1)
    row_sample = row_sample.at[:, 0].set(1).astype(jnp.int32)
    col_sample = col_sample.at[:, 0].set(1).astype(jnp.int32)
    row_count = _tab_count(row_sample)
    col_count = _tab_count(col_sample)

    x_hat = {
        "shape": {"counts": {"row": row_count, "col": col_count},
                  "embeds": {"row": row_sample, "col": col_sample}},
        "scale": {"preds": scale_preds},
        "continuous": {"preds": cont_preds},
        "ct_idx": ct_idx,
        "cb_ind1": cb_ind1,
    }
    all_loss = {
        "cb1": cb_loss1,
        "na1": jnp.float32(0.0),  # TODO(synk): encoder pre-encode loss (injected Encoder)
    }
    logs = {"row_probs": row_probs, "col_probs": col_probs}
    return x_hat, all_loss, logs


# ------------------------------------------------------------------- main -----
if __name__ == "__main__":
    root = jax.random.PRNGKey(0)
    k_param, k_data, k_sample = jax.random.split(root, 3)

    params = init_params(k_param)
    # inputs: continuous chart data (B, max_series_blocks, max_cont_blocks)
    x_cont = jax.random.normal(k_data, (B, MAX_SERIES, MAX_CONT), jnp.float32)
    ct_idx = jnp.array([0, 3], dtype=jnp.int32)        # chart-type indices

    x_hat, losses, logs = jax.jit(forward, static_argnames=("temp",))(
        params, x_cont, ct_idx, k_sample, temp=1.0)
    jax.block_until_ready(x_hat["continuous"]["preds"])
    jax.block_until_ready(x_hat["cb_ind1"])
    jax.block_until_ready(losses["cb1"])
    print("KERNEL_OK")
</pallas_src>

<mosaic_0001>
module attributes {stable_mosaic.version = 11 : i64} {
  func.func @_fused_forward_kernel(%arg0: memref<2x160xf32, #tpu.memory_space<vmem>>, %arg1: memref<2x1xi32, #tpu.memory_space<vmem>>, %arg2: memref<160x128xbf16, #tpu.memory_space<vmem>>, %arg3: memref<1x128xf32, #tpu.memory_space<vmem>>, %arg4: memref<128x32xf32, #tpu.memory_space<vmem>>, %arg5: memref<1x32xf32, #tpu.memory_space<vmem>>, %arg6: memref<32x512xf32, #tpu.memory_space<vmem>>, %arg7: memref<512x32xf32, #tpu.memory_space<vmem>>, %arg8: memref<1x512xf32, #tpu.memory_space<vmem>>, %arg9: memref<6x8xf32, #tpu.memory_space<vmem>>, %arg10: memref<8x1024xbf16, #tpu.memory_space<vmem>>, %arg11: memref<32x1024xbf16, #tpu.memory_space<vmem>>, %arg12: memref<1x1024xf32, #tpu.memory_space<vmem>>, %arg13: memref<640x640xbf16, #tpu.memory_space<vmem>>, %arg14: memref<2x1024xf32, #tpu.memory_space<vmem>>) attributes {dimension_semantics = [], scalar_prefetch = 0 : i64, scratch_operands = 0 : i64, tpu.core_type = #tpu.core_type<tc>} {
    %c0 = arith.constant 0 : index
    %c0_0 = arith.constant 0 : index
    %0 = vector.load %arg0[%c0, %c0_0] : memref<2x160xf32, #tpu.memory_space<vmem>>, vector<2x160xf32>
    %1 = arith.truncf %0 : vector<2x160xf32> to vector<2x160xbf16>
    %c0_1 = arith.constant 0 : index
    %c0_2 = arith.constant 0 : index
    %2 = vector.load %arg2[%c0_1, %c0_2] : memref<160x128xbf16, #tpu.memory_space<vmem>>, vector<160x128xbf16>
    %cst = arith.constant dense<0.000000e+00> : vector<2x128xf32>
    %3 = tpu.matmul %1, %2, %cst {dimension_numbers = #tpu.dot_dimension_numbers<[1], [0], [0], [1], [0, 0, 1, 1], [], []>} : vector<2x160xbf16>, vector<160x128xbf16>, vector<2x128xf32> -> vector<2x128xf32>
    %c0_3 = arith.constant 0 : index
    %c0_4 = arith.constant 0 : index
    %4 = vector.load %arg3[%c0_3, %c0_4] : memref<1x128xf32, #tpu.memory_space<vmem>>, vector<1x128xf32>
    %5 = vector.broadcast %4 : vector<1x128xf32> to vector<2x128xf32>
    %6 = arith.addf %3, %5 : vector<2x128xf32>
    %cst_5 = arith.constant 0.000000e+00 : f32
    %7 = vector.broadcast %cst_5 : f32 to vector<2x128xf32>
    %8 = arith.maximumf %6, %7 : vector<2x128xf32>
    %c0_6 = arith.constant 0 : index
    %c0_7 = arith.constant 0 : index
    %9 = vector.load %arg4[%c0_6, %c0_7] : memref<128x32xf32, #tpu.memory_space<vmem>>, vector<128x32xf32>
    %cst_8 = arith.constant dense<0.000000e+00> : vector<2x32xf32>
    %10 = tpu.matmul %8, %9, %cst_8 {dimension_numbers = #tpu.dot_dimension_numbers<[1], [0], [0], [1], [0, 0, 1, 1], [], []>} : vector<2x128xf32>, vector<128x32xf32>, vector<2x32xf32> -> vector<2x32xf32>
    %c0_9 = arith.constant 0 : index
    %c0_10 = arith.constant 0 : index
    %11 = vector.load %arg5[%c0_9, %c0_10] : memref<1x32xf32, #tpu.memory_space<vmem>>, vector<1x32xf32>
    %12 = vector.broadcast %11 : vector<1x32xf32> to vector<2x32xf32>
    %13 = arith.addf %10, %12 : vector<2x32xf32>
    %c0_11 = arith.constant 0 : index
    %c0_12 = arith.constant 0 : index
    %14 = vector.load %arg6[%c0_11, %c0_12] : memref<32x512xf32, #tpu.memory_space<vmem>>, vector<32x512xf32>
    %cst_13 = arith.constant dense<0.000000e+00> : vector<2x512xf32>
    %15 = tpu.matmul %13, %14, %cst_13 {dimension_numbers = #tpu.dot_dimension_numbers<[1], [0], [0], [1], [0, 0, 1, 1], [], []>} : vector<2x32xf32>, vector<32x512xf32>, vector<2x512xf32> -> vector<2x512xf32>
    %c0_14 = arith.constant 0 : index
    %c0_15 = arith.constant 0 : index
    %16 = vector.load %arg8[%c0_14, %c0_15] : memref<1x512xf32, #tpu.memory_space<vmem>>, vector<1x512xf32>
    %cst_16 = arith.constant 2.000000e+00 : f32
    %17 = vector.broadcast %cst_16 : f32 to vector<2x512xf32>
    %18 = arith.mulf %17, %15 : vector<2x512xf32>
    %19 = vector.broadcast %16 : vector<1x512xf32> to vector<2x512xf32>
    %20 = arith.subf %19, %18 : vector<2x512xf32>
    %21 = tpu.iota {dimensions = array<i32: 1>} : vector<2x128xi32>
    %22 = vector.extract_strided_slice %20 {offsets = [0, 0], sizes = [2, 128], strides = [1, 1]} : vector<2x512xf32> to vector<2x128xf32>
    %cst_17 = arith.constant dense<0x7F800000> : vector<2xf32>
    %23 = vector.multi_reduction <minimumf>, %22, %cst_17 [1] : vector<2x128xf32> to vector<2xf32>
    %24 = vector.shape_cast %23 : vector<2xf32> to vector<2x1xf32>
    %25 = vector.broadcast %24 : vector<2x1xf32> to vector<2x128xf32>
    %26 = arith.cmpf ole, %22, %25 : vector<2x128xf32>
    %c128_i32 = arith.constant 128 : i32
    %27 = vector.broadcast %c128_i32 : i32 to vector<2x128xi32>
    %28 = arith.select %26, %21, %27 : vector<2x128xi1>, vector<2x128xi32>
    %cst_18 = arith.constant dense<2147483647> : vector<2xi32>
    %29 = vector.multi_reduction <minsi>, %28, %cst_18 [1] : vector<2x128xi32> to vector<2xi32>
    %30 = vector.shape_cast %29 : vector<2xi32> to vector<2x1xi32>
    %31 = vector.broadcast %30 : vector<2x1xi32> to vector<2x128xi32>
    %32 = arith.cmpi eq, %21, %31 : vector<2x128xi32>
    %33 = arith.extui %32 : vector<2x128xi1> to vector<2x128xi32>
    %34 = arith.sitofp %33 : vector<2x128xi32> to vector<2x128xf32>
    %35 = vector.extract_strided_slice %20 {offsets = [0, 128], sizes = [2, 128], strides = [1, 1]} : vector<2x512xf32> to vector<2x128xf32>
    %cst_19 = arith.constant dense<0x7F800000> : vector<2xf32>
    %36 = vector.multi_reduction <minimumf>, %35, %cst_19 [1] : vector<2x128xf32> to vector<2xf32>
    %37 = vector.shape_cast %36 : vector<2xf32> to vector<2x1xf32>
    %38 = vector.broadcast %37 : vector<2x1xf32> to vector<2x128xf32>
    %39 = arith.cmpf ole, %35, %38 : vector<2x128xf32>
    %c128_i32_20 = arith.constant 128 : i32
    %40 = vector.broadcast %c128_i32_20 : i32 to vector<2x128xi32>
    %41 = arith.select %39, %21, %40 : vector<2x128xi1>, vector<2x128xi32>
    %cst_21 = arith.constant dense<2147483647> : vector<2xi32>
    %42 = vector.multi_reduction <minsi>, %41, %cst_21 [1] : vector<2x128xi32> to vector<2xi32>
    %43 = vector.shape_cast %42 : vector<2xi32> to vector<2x1xi32>
    %44 = vector.broadcast %43 : vector<2x1xi32> to vector<2x128xi32>
    %45 = arith.cmpi eq, %21, %44 : vector<2x128xi32>
    %46 = arith.extui %45 : vector<2x128xi1> to vector<2x128xi32>
    %47 = arith.sitofp %46 : vector<2x128xi32> to vector<2x128xf32>
    %48 = vector.extract_strided_slice %20 {offsets = [0, 256], sizes = [2, 128], strides = [1, 1]} : vector<2x512xf32> to vector<2x128xf32>
    %cst_22 = arith.constant dense<0x7F800000> : vector<2xf32>
    %49 = vector.multi_reduction <minimumf>, %48, %cst_22 [1] : vector<2x128xf32> to vector<2xf32>
    %50 = vector.shape_cast %49 : vector<2xf32> to vector<2x1xf32>
    %51 = vector.broadcast %50 : vector<2x1xf32> to vector<2x128xf32>
    %52 = arith.cmpf ole, %48, %51 : vector<2x128xf32>
    %c128_i32_23 = arith.constant 128 : i32
    %53 = vector.broadcast %c128_i32_23 : i32 to vector<2x128xi32>
    %54 = arith.select %52, %21, %53 : vector<2x128xi1>, vector<2x128xi32>
    %cst_24 = arith.constant dense<2147483647> : vector<2xi32>
    %55 = vector.multi_reduction <minsi>, %54, %cst_24 [1] : vector<2x128xi32> to vector<2xi32>
    %56 = vector.shape_cast %55 : vector<2xi32> to vector<2x1xi32>
    %57 = vector.broadcast %56 : vector<2x1xi32> to vector<2x128xi32>
    %58 = arith.cmpi eq, %21, %57 : vector<2x128xi32>
    %59 = arith.extui %58 : vector<2x128xi1> to vector<2x128xi32>
    %60 = arith.sitofp %59 : vector<2x128xi32> to vector<2x128xf32>
    %61 = vector.extract_strided_slice %20 {offsets = [0, 384], sizes = [2, 128], strides = [1, 1]} : vector<2x512xf32> to vector<2x128xf32>
    %cst_25 = arith.constant dense<0x7F800000> : vector<2xf32>
    %62 = vector.multi_reduction <minimumf>, %61, %cst_25 [1] : vector<2x128xf32> to vector<2xf32>
    %63 = vector.shape_cast %62 : vector<2xf32> to vector<2x1xf32>
    %64 = vector.broadcast %63 : vector<2x1xf32> to vector<2x128xf32>
    %65 = arith.cmpf ole, %61, %64 : vector<2x128xf32>
    %c128_i32_26 = arith.constant 128 : i32
    %66 = vector.broadcast %c128_i32_26 : i32 to vector<2x128xi32>
    %67 = arith.select %65, %21, %66 : vector<2x128xi1>, vector<2x128xi32>
    %cst_27 = arith.constant dense<2147483647> : vector<2xi32>
    %68 = vector.multi_reduction <minsi>, %67, %cst_27 [1] : vector<2x128xi32> to vector<2xi32>
    %69 = vector.shape_cast %68 : vector<2xi32> to vector<2x1xi32>
    %70 = vector.broadcast %69 : vector<2x1xi32> to vector<2x128xi32>
    %71 = arith.cmpi eq, %21, %70 : vector<2x128xi32>
    %72 = arith.extui %71 : vector<2x128xi1> to vector<2x128xi32>
    %73 = arith.sitofp %72 : vector<2x128xi32> to vector<2x128xf32>
    %74 = tpu.concatenate %34, %47, %60, %73 in 1 : vector<2x128xf32>, vector<2x128xf32>, vector<2x128xf32>, vector<2x128xf32> -> vector<2x512xf32>
    %c0_28 = arith.constant 0 : index
    %c0_29 = arith.constant 0 : index
    %75 = vector.load %arg7[%c0_28, %c0_29] : memref<512x32xf32, #tpu.memory_space<vmem>>, vector<512x32xf32>
    %cst_30 = arith.constant dense<0.000000e+00> : vector<2x32xf32>
    %76 = tpu.matmul %74, %75, %cst_30 {dimension_numbers = #tpu.dot_dimension_numbers<[1], [0], [0], [1], [0, 0, 1, 1], [], []>} : vector<2x512xf32>, vector<512x32xf32>, vector<2x32xf32> -> vector<2x32xf32>
    %77 = arith.subf %76, %13 : vector<2x32xf32>
    %78 = arith.mulf %77, %77 : vector<2x32xf32>
    %cst_31 = arith.constant dense<0.000000e+00> : vector<2xf32>
    %79 = vector.multi_reduction <add>, %78, %cst_31 [1] : vector<2x32xf32> to vector<2xf32>
    %80 = vector.shape_cast %79 : vector<2xf32> to vector<2x1xf32>
    %cst_32 = arith.constant dense<0.000000e+00> : vector<1xf32>
    %81 = vector.multi_reduction <add>, %80, %cst_32 [0] : vector<2x1xf32> to vector<1xf32>
    %82 = vector.shape_cast %81 : vector<1xf32> to vector<1x1xf32>
    %cst_33 = arith.constant 1.250000e+00 : f32
    %83 = vector.broadcast %cst_33 : f32 to vector<1x1xf32>
    %84 = arith.mulf %83, %82 : vector<1x1xf32>
    %cst_34 = arith.constant 6.400000e+01 : f32
    %85 = vector.broadcast %cst_34 : f32 to vector<1x1xf32>
    %86 = arith.divf %84, %85 : vector<1x1xf32>
    %87 = tpu.iota {dimensions = array<i32: 1>} : vector<2x6xi32>
    %c0_35 = arith.constant 0 : index
    %c0_36 = arith.constant 0 : index
    %88 = vector.load %arg1[%c0_35, %c0_36] : memref<2x1xi32, #tpu.memory_space<vmem>>, vector<2x1xi32>
    %89 = vector.broadcast %88 : vector<2x1xi32> to vector<2x6xi32>
    %90 = arith.cmpi eq, %87, %89 : vector<2x6xi32>
    %91 = arith.extui %90 : vector<2x6xi1> to vector<2x6xi32>
    %92 = arith.sitofp %91 : vector<2x6xi32> to vector<2x6xf32>
    %c0_37 = arith.constant 0 : index
    %c0_38 = arith.constant 0 : index
    %93 = vector.load %arg9[%c0_37, %c0_38] : memref<6x8xf32, #tpu.memory_space<vmem>>, vector<6x8xf32>
    %cst_39 = arith.constant dense<0.000000e+00> : vector<2x8xf32>
    %94 = tpu.matmul %92, %93, %cst_39 {dimension_numbers = #tpu.dot_dimension_numbers<[1], [0], [0], [1], [0, 0, 1, 1], [], []>} : vector<2x6xf32>, vector<6x8xf32>, vector<2x8xf32> -> vector<2x8xf32>
    %95 = arith.truncf %94 : vector<2x8xf32> to vector<2x8xbf16>
    %c0_40 = arith.constant 0 : index
    %c0_41 = arith.constant 0 : index
    %96 = vector.load %arg10[%c0_40, %c0_41] : memref<8x1024xbf16, #tpu.memory_space<vmem>>, vector<8x1024xbf16>
    %cst_42 = arith.constant dense<0.000000e+00> : vector<2x1024xf32>
    %97 = tpu.matmul %95, %96, %cst_42 {dimension_numbers = #tpu.dot_dimension_numbers<[1], [0], [0], [1], [0, 0, 1, 1], [], []>} : vector<2x8xbf16>, vector<8x1024xbf16>, vector<2x1024xf32> -> vector<2x1024xf32>
    %98 = arith.truncf %76 : vector<2x32xf32> to vector<2x32xbf16>
    %c0_43 = arith.constant 0 : index
    %c0_44 = arith.constant 0 : index
    %99 = vector.load %arg11[%c0_43, %c0_44] : memref<32x1024xbf16, #tpu.memory_space<vmem>>, vector<32x1024xbf16>
    %cst_45 = arith.constant dense<0.000000e+00> : vector<2x1024xf32>
    %100 = tpu.matmul %98, %99, %cst_45 {dimension_numbers = #tpu.dot_dimension_numbers<[1], [0], [0], [1], [0, 0, 1, 1], [], []>} : vector<2x32xbf16>, vector<32x1024xbf16>, vector<2x1024xf32> -> vector<2x1024xf32>
    %101 = arith.addf %97, %100 : vector<2x1024xf32>
    %c0_46 = arith.constant 0 : index
    %c0_47 = arith.constant 0 : index
    %102 = vector.load %arg12[%c0_46, %c0_47] : memref<1x1024xf32, #tpu.memory_space<vmem>>, vector<1x1024xf32>
    %103 = vector.broadcast %102 : vector<1x1024xf32> to vector<2x1024xf32>
    %104 = arith.addf %101, %103 : vector<2x1024xf32>
    %105 = vector.extract_strided_slice %104 {offsets = [0, 0], sizes = [2, 640], strides = [1, 1]} : vector<2x1024xf32> to vector<2x640xf32>
    %cst_48 = arith.constant 1.000000e+00 : f32
    %106 = vector.broadcast %cst_48 : f32 to vector<2x640xf32>
    %107 = arith.mulf %105, %106 : vector<2x640xf32>
    %cst_49 = arith.constant dense<0xFF800000> : vector<2xf32>
    %108 = vector.multi_reduction <maximumf>, %107, %cst_49 [1] : vector<2x640xf32> to vector<2xf32>
    %109 = vector.shape_cast %108 : vector<2xf32> to vector<2x1xf32>
    %110 = vector.broadcast %109 : vector<2x1xf32> to vector<2x640xf32>
    %111 = arith.subf %107, %110 : vector<2x640xf32>
    %112 = math.exp %111 : vector<2x640xf32>
    %113 = arith.truncf %112 : vector<2x640xf32> to vector<2x640xbf16>
    %c0_50 = arith.constant 0 : index
    %c0_51 = arith.constant 0 : index
    %114 = vector.load %arg13[%c0_50, %c0_51] : memref<640x640xbf16, #tpu.memory_space<vmem>>, vector<640x640xbf16>
    %cst_52 = arith.constant dense<0.000000e+00> : vector<2x640xf32>
    %115 = tpu.matmul %113, %114, %cst_52 {dimension_numbers = #tpu.dot_dimension_numbers<[1], [0], [0], [1], [0, 0, 1, 1], [], []>} : vector<2x640xbf16>, vector<640x640xbf16>, vector<2x640xf32> -> vector<2x640xf32>
    %cst_53 = arith.constant 1.000000e-30 : f32
    %116 = vector.broadcast %cst_53 : f32 to vector<2x640xf32>
    %117 = arith.maximumf %115, %116 : vector<2x640xf32>
    %118 = arith.divf %112, %117 : vector<2x640xf32>
    %119 = vector.extract_strided_slice %104 {offsets = [0, 640], sizes = [2, 128], strides = [1, 1]} : vector<2x1024xf32> to vector<2x128xf32>
    %120 = vector.extract_strided_slice %104 {offsets = [0, 768], sizes = [2, 256], strides = [1, 1]} : vector<2x1024xf32> to vector<2x256xf32>
    %121 = arith.negf %120 : vector<2x256xf32>
    %122 = math.exp %121 : vector<2x256xf32>
    %cst_54 = arith.constant 1.000000e+00 : f32
    %123 = vector.broadcast %cst_54 : f32 to vector<2x256xf32>
    %124 = arith.addf %123, %122 : vector<2x256xf32>
    %125 = arith.divf %123, %124 : vector<2x256xf32>
    %126 = tpu.iota {dimensions = array<i32: 1>} : vector<2x256xi32>
    %c160_i32 = arith.constant 160 : i32
    %127 = vector.broadcast %c160_i32 : i32 to vector<2x256xi32>
    %128 = arith.cmpi slt, %126, %127 : vector<2x256xi32>
    %cst_55 = arith.constant 0.000000e+00 : f32
    %129 = vector.broadcast %cst_55 : f32 to vector<2x256xf32>
    %130 = arith.select %128, %125, %129 : vector<2x256xi1>, vector<2x256xf32>
    %c160_i32_56 = arith.constant 160 : i32
    %131 = vector.broadcast %c160_i32_56 : i32 to vector<2x256xi32>
    %132 = arith.cmpi eq, %126, %131 : vector<2x256xi32>
    %133 = arith.sitofp %30 : vector<2x1xi32> to vector<2x1xf32>
    %134 = vector.shape_cast %133 : vector<2x1xf32> to vector<2x1xf32>
    %135 = vector.broadcast %134 : vector<2x1xf32> to vector<2x256xf32>
    %136 = arith.select %132, %135, %130 : vector<2x256xi1>, vector<2x256xf32>
    %c161_i32 = arith.constant 161 : i32
    %137 = vector.broadcast %c161_i32 : i32 to vector<2x256xi32>
    %138 = arith.cmpi eq, %126, %137 : vector<2x256xi32>
    %139 = arith.sitofp %43 : vector<2x1xi32> to vector<2x1xf32>
    %140 = vector.shape_cast %139 : vector<2x1xf32> to vector<2x1xf32>
    %141 = vector.broadcast %140 : vector<2x1xf32> to vector<2x256xf32>
    %142 = arith.select %138, %141, %136 : vector<2x256xi1>, vector<2x256xf32>
    %c162_i32 = arith.constant 162 : i32
    %143 = vector.broadcast %c162_i32 : i32 to vector<2x256xi32>
    %144 = arith.cmpi eq, %126, %143 : vector<2x256xi32>
    %145 = arith.sitofp %56 : vector<2x1xi32> to vector<2x1xf32>
    %146 = vector.shape_cast %145 : vector<2x1xf32> to vector<2x1xf32>
    %147 = vector.broadcast %146 : vector<2x1xf32> to vector<2x256xf32>
    %148 = arith.select %144, %147, %142 : vector<2x256xi1>, vector<2x256xf32>
    %c163_i32 = arith.constant 163 : i32
    %149 = vector.broadcast %c163_i32 : i32 to vector<2x256xi32>
    %150 = arith.cmpi eq, %126, %149 : vector<2x256xi32>
    %151 = arith.sitofp %69 : vector<2x1xi32> to vector<2x1xf32>
    %152 = vector.shape_cast %151 : vector<2x1xf32> to vector<2x1xf32>
    %153 = vector.broadcast %152 : vector<2x1xf32> to vector<2x256xf32>
    %154 = arith.select %150, %153, %148 : vector<2x256xi1>, vector<2x256xf32>
    %c164_i32 = arith.constant 164 : i32
    %155 = vector.broadcast %c164_i32 : i32 to vector<2x256xi32>
    %156 = arith.cmpi eq, %126, %155 : vector<2x256xi32>
    %157 = vector.shape_cast %86 : vector<1x1xf32> to vector<1x1xf32>
    %158 = vector.broadcast %157 : vector<1x1xf32> to vector<2x256xf32>
    %159 = arith.select %156, %158, %154 : vector<2x256xi1>, vector<2x256xf32>
    %160 = tpu.concatenate %118, %119, %159 in 1 : vector<2x640xf32>, vector<2x128xf32>, vector<2x256xf32> -> vector<2x1024xf32>
    %c0_57 = arith.constant 0 : index
    %c0_58 = arith.constant 0 : index
    %161 = vector.load %arg14[%c0_57, %c0_58] : memref<2x1024xf32, #tpu.memory_space<vmem>>, vector<2x1024xf32>
    tpu.vector_store %arg14[%c0_57, %c0_58], %160 {strides = array<i32>} : memref<2x1024xf32, #tpu.memory_space<vmem>>, vector<2x1024xf32>,
    return
  }
}

</mosaic_0001>

<bundles_post_ra>
// kernel: tile.13
= control target key start
LH: loop header
LB: loop body
LE: loop exit
PB: predicated region body
PF: predicated region fallthrough
CT: control target
= control target key end

     0   :  { %s22_s0 = inlined_call_operand.vmem [shape: f32[128], index: 0, kind: input, shape index: {}]   ;;  %s23_s1 = inlined_call_operand.vmem [shape: f32[4,128], index: 1, kind: output, shape index: {}]  }
   0x1   :  { %v4_v0 = vld [vmem:[%s22_s0] ss:$0 sm:$0xff] }
   0x2   :  { %5 = vst [vmem:[%s23_s1] sm:$0xf] %v4_v0 }

// kernel: forward.3
= control target key start
LH: loop header
LB: loop body
LE: loop exit
PB: predicated region body
PF: predicated region fallthrough
CT: control target
= control target key end

     0   :  { %19 = vsyncpa [#allocation3], 0  ;;  %s5623_s0 = inlined_call_operand.vmem [shape: f32[2,160], index: 0, kind: input, shape index: {}]   ;;  %s5624_s1 = inlined_call_operand.vmem [shape: s32[2,1], index: 1, kind: input, shape index: {}]   ;;  %s5625_s2 = inlined_call_operand.vmem [shape: bf16[160,128], index: 2, kind: input, shape index: {}]   ;;  %s5626_s3 = inlined_call_operand.vmem [shape: f32[1,128], index: 3, kind: input, shape index: {}]   ;;  %s5627_s4 = inlined_call_operand.vmem [shape: f32[128,32], index: 4, kind: input, shape index: {}]   ;;  %s5628_s5 = inlined_call_operand.vmem [shape: f32[1,32], index: 5, kind: input, shape index: {}]   ;;  %s5629_s6 = inlined_call_operand.vmem [shape: f32[32,512], index: 6, kind: input, shape index: {}]   ;;  %s5630_s7 = inlined_call_operand.vmem [shape: f32[512,32], index: 7, kind: input, shape index: {}]   ;;  %s5631_s8 = inlined_call_operand.vmem [shape: f32[1,512], index: 8, kind: input, shape index: {}]   ;;  %s5632_s9 = inlined_call_operand.hbm [shape: f32[6,8], index: 9, kind: input, shape index: {}]   ;;  %s5633_s10 = inlined_call_operand.hbm [shape: bf16[8,1024], index: 10, kind: input, shape index: {}]   ;;  %s5634_s11 = inlined_call_operand.vmem [shape: bf16[32,1024], index: 11, kind: input, shape index: {}]   ;;  %s5635_s12 = inlined_call_operand.hbm [shape: f32[1,1024], index: 12, kind: input, shape index: {}]   ;;  %s5636_s13 = inlined_call_operand.vmem [shape: bf16[640,640], index: 13, kind: input, shape index: {}]   ;;  %s5637_s14 = inlined_call_operand.vmem [shape: f32[2,1024], index: 14, kind: output, shape index: {}]  }
   0x1   :  { %20 = vsyncpa [#allocation5], 0  ;;  %s4224_s29 = smov [#allocation4]   ;;  %s4225_s15 = smov [#allocation2]  }
   0x2   :  { %s55_s30 = sshll.u32 %s4224_s29, 4  ;;  %s45_s16 = sshll.u32 %s4225_s15, 4  ;;  %s56_s30 = int_to_ptr.vmem [resolvable:$true] %s55_s30  ;;  %s46_s16 = int_to_ptr.vmem [resolvable:$true] %s45_s16 }
   0x3   :  { %s4154_s19 = scalar_lea.hbm %s5633_s10, 512 }
   0x4   :  { %p4155_p0 = scmp.ne.s32.totalorder %s5633_s10, %s4154_s19  ;;  %p4158_p1 = scmp.lt.u32.totalorder %s4154_s19, %s5633_s10 }
   0x6   :  { %p4160_p2 = pnand %p4158_p1, %p4155_p0 }
   0x8   :  { %4163 = shalt.err (!%p4160_p2)
}
   0x9   :  { %s4164_s24 = scalar_lea.vmem %s56_s30, 512  ;;  %p4169_p4 = scmp.lt.s32.totalorder %s56_s30, %s56_s30 }
   0xa   :  { %p4165_p3 = scmp.ne.s32.totalorder %s56_s30, %s4164_s24  ;;  %p4170_p5 = scmp.lt.s32.totalorder %s4164_s24, %s4164_s24 }
   0xc   :  { %p4171_p6 = por %p4170_p5, %p4169_p4 }
   0xe   :  { %p4172_p7 = pnand %p4171_p6, %p4165_p3 }
  0x10   :  { %4175 = shalt.err (!%p4172_p7)
}
  0x11   :  { %58 = dma.hbm_to_vmem [thread:$0]  %s5633_s10, 512, %s56_s30, [#allocation5]  }
  0x12   :  { %s4176_s29 = scalar_lea.hbm %s5632_s9, 128 }
  0x13   :  { %p4177_p8 = scmp.ne.s32.totalorder %s5632_s9, %s4176_s29  ;;  %p4180_p9 = scmp.lt.u32.totalorder %s4176_s29, %s5632_s9 }
  0x15   :  { %p4182_p10 = pnand %p4180_p9, %p4177_p8 }
  0x17   :  { %4185 = shalt.err (!%p4182_p10)
}
  0x18   :  { %s4186_s20 = scalar_lea.vmem %s46_s16, 128  ;;  %p4191_p12 = scmp.lt.s32.totalorder %s46_s16, %s46_s16 }
  0x19   :  { %p4187_p11 = scmp.ne.s32.totalorder %s46_s16, %s4186_s20  ;;  %p4192_p13 = scmp.lt.s32.totalorder %s4186_s20, %s4186_s20 }
  0x1b   :  { %p4193_p0 = por %p4192_p13, %p4191_p12 }
  0x1d   :  { %p4194_p1 = pnand %p4193_p0, %p4187_p11 }
  0x1f   :  { %4197 = shalt.err (!%p4194_p1)
}
  0x20   :  { %48 = dma.hbm_to_vmem [thread:$0]  %s5632_s9, 128, %s46_s16, [#allocation3]  }
  0x21   :  { %s4226_s21 = smov [#allocation6]   ;;  %s4198_s25 = scalar_lea.hbm %s5635_s12, 128 }
  0x22   :  { %s67_s22 = sshll.u32 %s4226_s21, 4  ;;  %p4199_p2 = scmp.ne.s32.totalorder %s5635_s12, %s4198_s25  ;;  %s68_s22 = int_to_ptr.vmem [resolvable:$true] %s67_s22 }
  0x23   :  { %p4202_p3 = scmp.lt.u32.totalorder %s4198_s25, %s5635_s12 }
  0x25   :  { %p4204_p4 = pnand %p4202_p3, %p4199_p2 }
  0x27   :  { %4207 = shalt.err (!%p4204_p4)
}
  0x28   :  { %s4208_s15 = scalar_lea.vmem %s68_s22, 128  ;;  %p4213_p6 = scmp.lt.s32.totalorder %s68_s22, %s68_s22 }
  0x29   :  { %p4209_p5 = scmp.ne.s32.totalorder %s68_s22, %s4208_s15  ;;  %p4214_p7 = scmp.lt.s32.totalorder %s4208_s15, %s4208_s15 }
  0x2b   :  { %p4215_p8 = por %p4214_p7, %p4213_p6 }
  0x2d   :  { %p4216_p9 = pnand %p4215_p8, %p4209_p5 }
  0x2f   :  { %4219 = shalt.err (!%p4216_p9)
}
  0x30   :  { %70 = dma.hbm_to_vmem [thread:$0]  %s5635_s12, 128, %s68_s22, [#allocation5]  }
  0x31   :  { %4220 = dma.done.wait [#allocation3], 128  }
  0x32   :  { %4221 = vsyncadd [#allocation3], 4294967168 }
  0x33   :  { %4222 = dma.done.wait [#allocation5], 640  }
  0x34   :  { %4223 = vsyncadd [#allocation5], 4294966656  ;;  %v4227_v0 = vmov 0   ;;  %v4228_v1 = vmov 0.0|0.0   ;;  %v3828_v2 = vld [vmem:[%s5625_s2] sm:$0xff]   ;;  %v3829_v3 = vld [vmem:[%s5625_s2 + $0x8] sm:$0xff]  }
  0x35   :  { %188 = vmatprep.subr.bf16.mxu0 %v4227_v0  ;;  %3698 = vmatprep.subr.bf16.mxu1 %v4228_v1  ;;  %v3830_v4 = vld [vmem:[%s5625_s2 + $0x10] sm:$0xff]   ;;  %v3831_v5 = vld [vmem:[%s5625_s2 + $0x18] sm:$0xff]   ;;  %v3231_v6 = vld.sshfl [vmem:[%s5623_s0] sm:$0x33 pattern:$0x76325410] }
  0x36   :  { %3827 = vset.pattern.permute.xlu0 %v4227_v0  ;;  %189 = vmatpush1.bf16.msra.mxu0 %v3828_v2  ;;  %v229_v7 = vld [vmem:[%s5627_s4] sm:$0xff]  ;;  %v230_v8 = vld [vmem:[%s5627_s4 + $0x8] sm:$0xff]  ;;  %v92_v9 = vcombine.high %v3231_v6, %v3231_v6  ;;  %v231_v11 = vld [vmem:[%s5627_s4 + $0x10] sm:$0xff]  ;;  %vm184_vm0 = vcmask 261120   ;;  %v95_v36 = vpack.c.bf16 %v3231_v6, %v3231_v6  ;;  %vm4229_vm1 = vmmov 0  }
  0x37   :  { %190 = vmatprep.subr.bf16.mxu0 %v4227_v0  ;;  %v3699_v10 = vpack.c.bf16 %v230_v8, %v229_v7  ;;  %v232_v12 = vld [vmem:[%s5627_s4 + $0x18] sm:$0xff]  ;;  %v3832_v15 = vld [vmem:[%s5625_s2 + $0x20] sm:$0xff]   ;;  %v234_v17 = vld [vmem:[%s5627_s4 + $0x28] sm:$0xff]  ;;  %v4230_v40 = vmov 0.0   ;;  %vm515_vm2 = vcmask 1041408   ;;  %vm840_vm14 = vcmask 1045504  }
  0x38   :  { %v96_v13 = vpack.c.bf16 %v92_v9, %v92_v9  ;;  %v3702_v14 = vpack.c.bf16 %v232_v12, %v231_v11  ;;  %v233_v16 = vld [vmem:[%s5627_s4 + $0x20] sm:$0xff]  ;;  %v3833_v18 = vld [vmem:[%s5625_s2 + $0x28] sm:$0xff]   ;;  %v235_v19 = vld [vmem:[%s5627_s4 + $0x30] sm:$0xff]  ;;  %3670 = vmatprep.mubr.msk.f32.mxu1 %vm4229_vm1, %v4230_v40 }
  0x39   :  { %3700 = vmatpush3.bf16.msra.mxu1 %v3699_v10  ;;  %v236_v20 = vld [vmem:[%s5627_s4 + $0x38] sm:$0xff]  ;;  %v3705_v21 = vpack.c.bf16 %v234_v17, %v233_v16  ;;  %v3834_v22 = vld [vmem:[%s5625_s2 + $0x30] sm:$0xff]   ;;  %v237_v23 = vld [vmem:[%s5627_s4 + $0x40] sm:$0xff] }
  0x3a   :  { %191 = vmatpush1.bf16.msra.mxu0 %v3829_v3  ;;  %3701 = vmatprep.subr.bf16.mxu1 %v4228_v1  ;;  %v238_v24 = vld [vmem:[%s5627_s4 + $0x48] sm:$0xff]  ;;  %v3708_v25 = vpack.c.bf16 %v236_v20, %v235_v19  ;;  %v3835_v26 = vld [vmem:[%s5625_s2 + $0x38] sm:$0xff]   ;;  %v239_v27 = vld [vmem:[%s5627_s4 + $0x50] sm:$0xff] }
  0x3b   :  { %192 = vmatprep.subr.bf16.mxu0 %v4227_v0  ;;  %3243 = vmatprep.mubr.msk.bf16.mxu0 %vm184_vm0, %v96_v13  ;;  %v240_v28 = vld [vmem:[%s5627_s4 + $0x58] sm:$0xff]  ;;  %v3711_v29 = vpack.c.bf16 %v238_v24, %v237_v23  ;;  %v3836_v30 = vld [vmem:[%s5625_s2 + $0x40] sm:$0xff]   ;;  %v242_v32 = vld [vmem:[%s5627_s4 + $0x68] sm:$0xff]  ;;  %v489_v13 = vlaneseq }
  0x3c   :  { %v241_v31 = vld [vmem:[%s5627_s4 + $0x60] sm:$0xff]  ;;  %v3714_v33 = vpack.c.bf16 %v240_v28, %v239_v27  ;;  %v3837_v34 = vld [vmem:[%s5625_s2 + $0x48] sm:$0xff]   ;;  %v243_v37 = vld [vmem:[%s5627_s4 + $0x70] sm:$0xff] }
  0x3d   :  { %3703 = vmatpush3.bf16.msra.mxu1 %v3702_v14  ;;  %v3717_v35 = vpack.c.bf16 %v242_v32, %v241_v31  ;;  %v244_v38 = vld [vmem:[%s5627_s4 + $0x78] sm:$0xff]  ;;  %v323_v41 = vld [vmem:[%s5629_s6 + $0x8] sm:$0xff]  ;;  %v322_v43 = vld [vmem:[%s5629_s6] sm:$0xff]  ;;  %v4509_v14 = vshrl.u32 %v489_v13, 7 }
  0x3e   :  { %193 = vmatpush1.bf16.msra.mxu0 %v3830_v4  ;;  %3704 = vmatprep.subr.bf16.mxu1 %v4228_v1  ;;  %v3720_v39 = vpack.c.bf16 %v244_v38, %v243_v37  ;;  %v327_v42 = vld [vmem:[%s5629_s6 + $0x28] sm:$0xff]  ;;  %v326_v45 = vld [vmem:[%s5629_s6 + $0x20] sm:$0xff]  ;;  %v325_v60 = vld [vmem:[%s5629_s6 + $0x18] sm:$0xff] }
  0x3f   :  { %194 = vmatprep.subr.bf16.mxu0 %v4227_v0  ;;  %v3722_v44 = vpack.c.bf16 %v327_v42, %v323_v41  ;;  %v331_v46 = vld [vmem:[%s5629_s6 + $0x48] sm:$0xff]  ;;  %v3724_v48 = vpack.c.bf16 %v326_v45, %v322_v43  ;;  %v330_v50 = vld [vmem:[%s5629_s6 + $0x40] sm:$0xff]  ;;  %v329_v61 = vld [vmem:[%s5629_s6 + $0x38] sm:$0xff]  ;;  %v495_v17 = vsub.s32 1, %v4509_v14  ;;  %v503_v27 = vsub.s32 3, %v4509_v14 }
  0x40   :  { %v335_v47 = vld [vmem:[%s5629_s6 + $0x68] sm:$0xff]  ;;  %v334_v51 = vld [vmem:[%s5629_s6 + $0x60] sm:$0xff]  ;;  %v3730_v62 = vpack.c.bf16 %v329_v61, %v325_v60  ;;  %v324_v63 = vld [vmem:[%s5629_s6 + $0x10] sm:$0xff]  ;;  %v4530_v41 = vand.u32 127, %v489_v13 }
  0x41   :  { %3706 = vmatpush3.bf16.msra.mxu1 %v3705_v21  ;;  %v3726_v49 = vpack.c.bf16 %v335_v47, %v331_v46  ;;  %v3728_v52 = vpack.c.bf16 %v334_v51, %v330_v50  ;;  %v3232_v53 = vld [vmem:[%s5626_s3] ss:$0 sm:$0xff]  ;;  %v333_v3 = vld [vmem:[%s5629_s6 + $0x58] sm:$0xff]  ;;  %v332_v10 = vld [vmem:[%s5629_s6 + $0x50] sm:$0xff] }
  0x42   :  { %195 = vmatpush1.bf16.msra.mxu0 %v3831_v5  ;;  %3707 = vmatprep.subr.bf16.mxu1 %v4228_v1  ;;  %v3244_v2 = vld [vmem:[%s5628_s5] ss:$0 sm:$0xff]  ;;  %v337_v4 = vld [vmem:[%s5629_s6 + $0x78] sm:$0xff]  ;;  %v336_v11 = vld [vmem:[%s5629_s6 + $0x70] sm:$0xff] }
  0x43   :  { %196 = vmatprep.subr.bf16.mxu0 %v4227_v0  ;;  %v3734_v9 = vpack.c.bf16 %v337_v4, %v333_v3  ;;  %v3736_v12 = vpack.c.bf16 %v336_v11, %v332_v10  ;;  %v483_v16 = vld [vmem:[%s5631_s8] sm:$0xf]  ;;  %v609_v3 = vld [vmem:[%s5630_s7 + $0x8] sm:$0xff]  ;;  %v626_v4 = vld [vmem:[%s5630_s7 + $0x90] sm:$0xff] }
  0x44   :  { %v496_v20 = vrot.slane %v483_v16, %v495_v17  ;;  %v504_v32 = vrot.slane %v483_v16, %v503_v27  ;;  %v611_v10 = vld [vmem:[%s5630_s7 + $0x18] sm:$0xff]  ;;  %v656_v11 = vld [vmem:[%s5630_s7 + $0x180] sm:$0xff] }
  0x45   :  { %3709 = vmatpush3.bf16.msra.mxu1 %v3708_v25  ;;  %v499_v25 = vsub.s32 2, %v4509_v14  ;;  %v628_v13 = vld [vmem:[%s5630_s7 + $0xa0] sm:$0xff] }
  0x46   :  { %197 = vmatpush1.bf16.msra.mxu0 %v3832_v15  ;;  %3710 = vmatprep.subr.bf16.mxu1 %v4228_v1  ;;  %v491_v15 = vsub.s32 0, %v4509_v14 }
  0x47   :  { %198 = vmatprep.subr.bf16.mxu0 %v4227_v0 }
  0x49   :  { %3712 = vmatpush3.bf16.msra.mxu1 %v3711_v29 }
  0x4a   :  { %199 = vmatpush1.bf16.msra.mxu0 %v3833_v18  ;;  %3713 = vmatprep.subr.bf16.mxu1 %v4228_v1  ;;  %v492_v18 = vrot.slane %v483_v16, %v491_v15 }
  0x4b   :  { %200 = vmatprep.subr.bf16.mxu0 %v4227_v0 }
  0x4d   :  { %3715 = vmatpush3.bf16.msra.mxu1 %v3714_v33 }
  0x4e   :  { %201 = vmatpush1.bf16.msra.mxu0 %v3834_v22  ;;  %3716 = vmatprep.subr.bf16.mxu1 %v4228_v1 }
  0x4f   :  { %202 = vmatprep.subr.bf16.mxu0 %v4227_v0 }
  0x51   :  { %3718 = vmatpush3.bf16.msra.mxu1 %v3717_v35 }
  0x52   :  { %203 = vmatpush1.bf16.msra.mxu0 %v3835_v26  ;;  %3719 = vmatprep.subr.bf16.mxu1 %v4228_v1  ;;  %v328_v1 = vld [vmem:[%s5629_s6 + $0x30] sm:$0xff] }
  0x53   :  { %204 = vmatprep.subr.bf16.mxu0 %v4227_v0  ;;  %v3732_v6 = vpack.c.bf16 %v328_v1, %v324_v63  ;;  %v625_v63 = vld [vmem:[%s5630_s7 + $0x88] sm:$0xff]  ;;  %v608_v1 = vld [vmem:[%s5630_s7] sm:$0xff] }
  0x55   :  { %3721 = vmatpush3.bf16.msra.mxu1 %v3720_v39 }
  0x56   :  { %205 = vmatpush1.bf16.msra.mxu0 %v3836_v30  ;;  %v500_v30 = vrot.slane %v483_v16, %v499_v25  ;;  %v629_v16 = vld [vmem:[%s5630_s7 + $0xa8] sm:$0xff] }
  0x57   :  { %206 = vmatprep.subr.bf16.mxu0 %v4227_v0 }
  0x5a   :  { %207 = vmatpush1.bf16.msra.mxu0 %v3837_v34 }
  0x5b   :  { %3723 = vmatprep.subr.bf16.mxu0 %v3722_v44 }
  0x5d   :  { %221 = vmatmul.mubr.bf16.vlgmr.msra.gmra.mrb[0].mxu0 %v95_v36 }
  0x5e   :  { %405 = vmatprep.mubr.f32.mxu0 %v4230_v40  ;;  %3725 = vmatpush1.bf16.msra.mxu0 %v3724_v48 }
  0x5f   :  { %3727 = vmatprep.subr.bf16.mxu0 %v3726_v49 }
  0x62   :  { %3729 = vmatpush1.bf16.msra.mxu0 %v3728_v52 }
  0x63   :  { %3731 = vmatprep.subr.bf16.mxu0 %v3730_v62  ;;  %v624_v62 = vld [vmem:[%s5630_s7 + $0x80] sm:$0xff] }
 0x130   :  { %v222_v54 = vpop.f32.mrb[0].mxu0 }
 0x131   :  { %v223_v55 = vadd.f32 %v3232_v53, %v222_v54  ;;  %v224_v56 = vpop.f32.mrb[1].mxu0 }
 0x132   :  { %v225_v57 = vpop.f32.mrb[2].mxu0 }
 0x133   :  { %v228_v58 = vmax.f32 %v223_v55, 0.0  ;;  %v226_v59 = vpop.f32.mrb[3].mxu0 }
 0x135   :  { %3671 = vmatmul.mubr.f32.vlgmr.msra.gmra.mrb[0].mxu1 %v228_v58 }
 0x208   :  { %v318_v5 = vpop.f32.mrb[0].mxu1 }
 0x209   :  { %v4496_v7 = vadd.f32 %v3244_v2, %v318_v5  ;;  %v3672_v8 = vpop.f32.mrb[1].mxu1  ;;  %v3738_v2 = vpack.c.bf16 %v625_v63, %v624_v62  ;;  %v627_v5 = vld [vmem:[%s5630_s7 + $0x98] sm:$0xff]  ;;  %v646_v62 = vld [vmem:[%s5630_s7 + $0x130] sm:$0xff] }
 0x20a   :  { %v3742_v8 = vpack.c.bf16 %v627_v5, %v626_v4  ;;  %v647_v63 = vld [vmem:[%s5630_s7 + $0x138] sm:$0xff]  ;;  %v634_v4 = vld [vmem:[%s5630_s7 + $0xd0] sm:$0xff] }
 0x20b   :  { %3245 = vmatmul.mubr.msk.f32.vlgmr.msra.gmra.mrb[4].mxu0 %vm184_vm0, %v4496_v7  ;;  %3739 = vmatprep.subr.bf16.mxu1 %v3738_v2  ;;  %v616_v2 = vld [vmem:[%s5630_s7 + $0x40] sm:$0xff]  ;;  %v635_v5 = vld [vmem:[%s5630_s7 + $0xd8] sm:$0xff] }
 0x20c   :  { %3733 = vmatpush1.bf16.msra.mxu0 %v3732_v6  ;;  %476 = vmatprep.mubr.f32.mxu0 %v4230_v40  ;;  %v3740_v6 = vpack.c.bf16 %v609_v3, %v608_v1  ;;  %v617_v3 = vld [vmem:[%s5630_s7 + $0x48] sm:$0xff] }
 0x20d   :  { %3735 = vmatprep.subr.bf16.mxu0 %v3734_v9  ;;  %v610_v9 = vld [vmem:[%s5630_s7 + $0x10] sm:$0xff] }
 0x20e   :  { %3741 = vmatpush3.bf16.msra.mxu1 %v3740_v6  ;;  %v3784_v6 = vpack.c.bf16 %v647_v63, %v646_v62  ;;  %v652_v63 = vld [vmem:[%s5630_s7 + $0x160] sm:$0xff] }
 0x20f   :  { %3743 = vmatprep.subr.bf16.mxu1 %v3742_v8  ;;  %v3756_v8 = vpack.c.bf16 %v617_v3, %v616_v2  ;;  %v828_v3 = vld [vmem:[%s5624_s1] sm:$0x3] }
 0x210   :  { %3737 = vmatpush1.bf16.msra.mxu0 %v3736_v12  ;;  %v657_v12 = vld [vmem:[%s5630_s7 + $0x188] sm:$0xff] }
 0x213   :  { %3246 = vmatmul.mubr.msk.f32.vlgmr.msra.gmra.mrb[6].mxu0 %vm184_vm0, %v4496_v7 }
 0x2de   :  { %v407_v19 = vpop.f32.mrb[4].mxu0 }
 0x2df   :  { %v484_v21 = vmul.f32 2.0, %v407_v19  ;;  %v409_v22 = vpop.f32.mrb[5].mxu0  ;;  %v3770_v19 = vpack.c.bf16 %v657_v12, %v656_v11  ;;  %v619_v11 = vld [vmem:[%s5630_s7 + $0x58] sm:$0xff] }
 0x2e0   :  { %v485_v23 = vmul.f32 2.0, %v409_v22  ;;  %v612_v22 = vld [vmem:[%s5630_s7 + $0x20] sm:$0xff] }
 0x2e1   :  { %v509_v24 = vsub.f32 %v492_v18, %v484_v21  ;;  %v3744_v18 = vpack.c.bf16 %v611_v10, %v610_v9  ;;  %v641_v21 = vld [vmem:[%s5630_s7 + $0x108] sm:$0xff]  ;;  %3771 = vmatprep.subr.bf16.mxu0 %v3770_v19  ;;  %v3758_v9 = vpack.c.bf16 %v635_v5, %v634_v4  ;;  %v618_v10 = vld [vmem:[%s5630_s7 + $0x50] sm:$0xff]  ;;  %v671_v5 = vld [vmem:[%s5630_s7 + $0x1f8] sm:$0xff] }
 0x2e2   :  { %v510_v26 = vsub.f32 %v496_v20, %v485_v23  ;;  %v640_v20 = vld [vmem:[%s5630_s7 + $0x100] sm:$0xff]  ;;  %v3746_v23 = vpack.c.bf16 %v629_v16, %v628_v13  ;;  %v3760_v12 = vpack.c.bf16 %v619_v11, %v618_v10  ;;  %v670_v4 = vld [vmem:[%s5630_s7 + $0x1f0] sm:$0xff] }
 0x2e3   :  { %v516_v28 = vsel %vm515_vm2, %v509_v24, inf  ;;  %3745 = vmatpush3.bf16.msra.mxu1 %v3744_v18 }
 0x2e4   :  { %517 = vmin.xlane.f32.xlu1 %v516_v28  ;;  %v539_v29 = vsel %vm515_vm2, %v510_v26, inf  ;;  %v658_v28 = vld [vmem:[%s5630_s7 + $0x190] sm:$0xff]  ;;  %3747 = vmatprep.subr.bf16.mxu1 %v3746_v23 }
 0x2e5   :  { %540 = vmin.xlane.f32.xlu0 %v539_v29  ;;  %v659_v29 = vld [vmem:[%s5630_s7 + $0x198] sm:$0xff] }
 0x2e6   :  { %v478_v31 = vpop.f32.mrb[6].mxu0 }
 0x2e7   :  { %v486_v33 = vmul.f32 2.0, %v478_v31  ;;  %v480_v34 = vpop.f32.mrb[7].mxu0  ;;  %v630_v31 = vld [vmem:[%s5630_s7 + $0xb0] sm:$0xff] }
 0x2e8   :  { %v487_v35 = vmul.f32 2.0, %v480_v34  ;;  %v643_v34 = vld [vmem:[%s5630_s7 + $0x118] sm:$0xff] }
 0x2e9   :  { %v511_v36 = vsub.f32 %v500_v30, %v486_v33  ;;  %v3774_v30 = vpack.c.bf16 %v659_v29, %v658_v28  ;;  %v642_v33 = vld [vmem:[%s5630_s7 + $0x110] sm:$0xff] }
 0x2ea   :  { %v512_v37 = vsub.f32 %v504_v32, %v487_v35  ;;  %v631_v32 = vld [vmem:[%s5630_s7 + $0xb8] sm:$0xff] }
 0x2eb   :  { %v562_v38 = vsel %vm515_vm2, %v511_v36, inf }
 0x2ec   :  { %563 = vmin.xlane.f32.xlu1 %v562_v38  ;;  %v585_v39 = vsel %vm515_vm2, %v512_v37, inf  ;;  %v660_v38 = vld [vmem:[%s5630_s7 + $0x1a0] sm:$0xff] }
 0x2ed   :  { %586 = vmin.xlane.f32.xlu0 %v585_v39  ;;  %v661_v39 = vld [vmem:[%s5630_s7 + $0x1a8] sm:$0xff] }
 0x371   :  { %v518_v42 = vpop.xlane.xlu1 %517 }
 0x372   :  { %vm519_vm3 = vcmp.le.f32.partialorder %v509_v24, %v518_v42  ;;  %v541_v43 = vpop.xlane.xlu0 %540  ;;  %v3772_v24 = vpack.c.bf16 %v641_v21, %v640_v20  ;;  %v3750_v42 = vpack.c.bf16 %v631_v32, %v630_v31  ;;  %v637_v31 = vld [vmem:[%s5630_s7 + $0xe8] sm:$0xff] }
 0x373   :  { %v520_v44 = vsel %vm519_vm3, %v4530_v41, 128  ;;  %vm542_vm4 = vcmp.le.f32.partialorder %v510_v26, %v541_v43  ;;  %v613_v26 = vld [vmem:[%s5630_s7 + $0x28] sm:$0xff]  ;;  %v615_v43 = vld [vmem:[%s5630_s7 + $0x38] sm:$0xff] }
 0x374   :  { %v543_v45 = vsel %vm542_vm4, %v4530_v41, 128  ;;  %v4535_v46 = vsel %vm515_vm2, %v520_v44, 2147483647  ;;  %3773 = vmatpush3.bf16.msra.mxu0 %v3772_v24  ;;  %v3748_v35 = vpack.c.bf16 %v613_v26, %v612_v22  ;;  %v3778_v44 = vpack.c.bf16 %v661_v39, %v660_v38  ;;  %v666_v38 = vld [vmem:[%s5630_s7 + $0x1d0] sm:$0xff]  ;;  %v667_v39 = vld [vmem:[%s5630_s7 + $0x1d8] sm:$0xff] }
 0x375   :  { %v4538_v47 = vsel %vm515_vm2, %v543_v45, 2147483647  ;;  %v523_v50 = vshra.s32 %v4535_v46, 16  ;;  %3775 = vmatprep.subr.bf16.mxu0 %v3774_v30  ;;  %v644_v45 = vld [vmem:[%s5630_s7 + $0x120] sm:$0xff]  ;;  %v522_v19 = vand.u32 65535, %v4535_v46  ;;  %vm836_vm4 = vcmask 48128  }
 0x376   :  { %v546_v48 = vshra.s32 %v4538_v47, 16  ;;  %3749 = vmatpush3.bf16.msra.mxu1 %v3748_v35  ;;  %v545_v13 = vand.u32 65535, %v4538_v47  ;;  %v621_v35 = vld [vmem:[%s5630_s7 + $0x68] sm:$0xff] }
 0x377   :  { %v4547_v55 = vcvt.s32.f32 %v523_v50  ;;  %v632_v50 = vld [vmem:[%s5630_s7 + $0xc0] sm:$0xff]  ;;  %3751 = vmatprep.subr.bf16.mxu1 %v3750_v42  ;;  %v524_v22 = vcvt.s32.f32 %v522_v19  ;;  %v3790_v42 = vpack.c.bf16 %v667_v39, %v666_v38 }
 0x378   :  { %v4541_v49 = vcvt.s32.f32 %v546_v48  ;;  %v645_v48 = vld [vmem:[%s5630_s7 + $0x128] sm:$0xff]  ;;  %v547_v18 = vcvt.s32.f32 %v545_v13 }
 0x379   :  { %v564_v51 = vpop.xlane.xlu1 %563 }
 0x37a   :  { %vm565_vm5 = vcmp.le.f32.partialorder %v511_v36, %v564_v51  ;;  %v587_v52 = vpop.xlane.xlu0 %586  ;;  %549 = vmin.xlane.f32.xlu0 %v4541_v49  ;;  %v3776_v36 = vpack.c.bf16 %v643_v34, %v642_v33  ;;  %v633_v51 = vld [vmem:[%s5630_s7 + $0xc8] sm:$0xff]  ;;  %v620_v34 = vld [vmem:[%s5630_s7 + $0x60] sm:$0xff] }
 0x37b   :  { %v566_v53 = vsel %vm565_vm5, %v4530_v41, 128  ;;  %vm588_vm6 = vcmp.le.f32.partialorder %v512_v37, %v587_v52  ;;  %v614_v37 = vld [vmem:[%s5630_s7 + $0x30] sm:$0xff]  ;;  %v3754_v1 = vpack.c.bf16 %v633_v51, %v632_v50  ;;  %v649_v33 = vld [vmem:[%s5630_s7 + $0x148] sm:$0xff]  ;;  %v651_v50 = vld [vmem:[%s5630_s7 + $0x158] sm:$0xff]  ;;  %vm1207_vm5 = vcmask 1043456  }
 0x37c   :  { %v589_v54 = vsel %vm588_vm6, %v4530_v41, 128  ;;  %v4550_v56 = vsel %vm515_vm2, %v566_v53, 2147483647  ;;  %v662_v52 = vld [vmem:[%s5630_s7 + $0x1b0] sm:$0xff]  ;;  %3777 = vmatpush3.bf16.msra.mxu0 %v3776_v36  ;;  %v3780_v53 = vpack.c.bf16 %v645_v48, %v644_v45  ;;  %vm1203_vm6 = vcmask 64512  }
 0x37d   :  { %v4553_v57 = vsel %vm515_vm2, %v589_v54, 2147483647  ;;  %v569_v60 = vshra.s32 %v4550_v56, 16  ;;  %v663_v54 = vld [vmem:[%s5630_s7 + $0x1b8] sm:$0xff]  ;;  %3779 = vmatprep.subr.bf16.mxu0 %v3778_v44  ;;  %v568_v46 = vand.u32 65535, %v4550_v56  ;;  %v665_v56 = vld [vmem:[%s5630_s7 + $0x1c8] sm:$0xff] }
 0x37e   :  { %526 = vmin.xlane.f32.xlu0 %v4547_v55  ;;  %v592_v58 = vshra.s32 %v4553_v57, 16  ;;  %v591_v23 = vand.u32 65535, %v4553_v57  ;;  %v639_v44 = vld [vmem:[%s5630_s7 + $0xf8] sm:$0xff]  ;;  %v650_v45 = vld [vmem:[%s5630_s7 + $0x150] sm:$0xff] }
 0x37f   :  { %v4561_v61 = vcvt.s32.f32 %v569_v60  ;;  %v3782_v60 = vpack.c.bf16 %v663_v54, %v662_v52  ;;  %v570_v29 = vcvt.s32.f32 %v568_v46  ;;  %v622_v51 = vld [vmem:[%s5630_s7 + $0x70] sm:$0xff]  ;;  %v623_v52 = vld [vmem:[%s5630_s7 + $0x78] sm:$0xff]  ;;  %v4231_v46 = vmov 1.0  }
 0x380   :  { %v4557_v59 = vcvt.s32.f32 %v592_v58  ;;  %v3752_v58 = vpack.c.bf16 %v615_v43, %v614_v37  ;;  %3781 = vmatpush3.bf16.msra.mxu0 %v3780_v53  ;;  %v593_v26 = vcvt.s32.f32 %v591_v23  ;;  %v3764_v37 = vpack.c.bf16 %v621_v35, %v620_v34  ;;  %v638_v43 = vld [vmem:[%s5630_s7 + $0xf0] sm:$0xff] }
 0x381   :  { %3783 = vmatprep.subr.bf16.mxu0 %v3782_v60  ;;  %v3766_v48 = vpack.c.bf16 %v639_v44, %v638_v43  ;;  %v3792_v53 = vpack.c.bf16 %v651_v50, %v650_v45  ;;  %v3768_v54 = vpack.c.bf16 %v623_v52, %v622_v51  ;;  %v669_v60 = vld [vmem:[%s5630_s7 + $0x1e8] sm:$0xff]  ;;  %v932_v43 = vld [vmem:[%s5634_s11 + $0x60] sm:$0xff] }
 0x382   :  { %595 = vmin.xlane.f32.xlu1 %v4557_v59  ;;  %3753 = vmatpush3.bf16.msra.mxu1 %v3752_v58  ;;  %v668_v58 = vld [vmem:[%s5630_s7 + $0x1e0] sm:$0xff]  ;;  %v929_v44 = vld [vmem:[%s5634_s11 + $0x48] sm:$0xff] }
 0x383   :  { %3755 = vmatprep.subr.bf16.mxu1 %v3754_v1  ;;  %v3794_v62 = vpack.c.bf16 %v669_v60, %v668_v58  ;;  %v653_v1 = vld [vmem:[%s5630_s7 + $0x168] sm:$0xff]  ;;  %v923_v58 = vld [vmem:[%s5634_s11 + $0x18] sm:$0xff] }
 0x384   :  { %3785 = vmatpush3.bf16.msra.mxu0 %v3784_v6  ;;  %v3796_v2 = vpack.c.bf16 %v653_v1, %v652_v63  ;;  %v3798_v6 = vpack.c.bf16 %v671_v5, %v670_v4  ;;  %v927_v63 = vld [vmem:[%s5634_s11 + $0x38] sm:$0xff] }
 0x385   :  { %v3264_v1 = vcombine.low %v923_v58, %v927_v63 }
 0x386   :  { %572 = vmin.xlane.f32.xlu1 %v4561_v61  ;;  %3757 = vmatpush3.bf16.msra.mxu1 %v3756_v8  ;;  %v654_v8 = vld [vmem:[%s5630_s7 + $0x170] sm:$0xff] }
 0x387   :  { %3759 = vmatprep.subr.bf16.mxu1 %v3758_v9  ;;  %v655_v9 = vld [vmem:[%s5630_s7 + $0x178] sm:$0xff] }
 0x388   :  { %v3800_v10 = vpack.c.bf16 %v655_v9, %v654_v8 }
 0x38a   :  { %3761 = vmatpush3.bf16.msra.mxu1 %v3760_v12 }
 0x407   :  { %v4685_v16 = vpop.xlane.xlu0 %549 }
 0x408   :  { %vm551_vm7 = vcmp.eq.f32.partialorder %v4541_v49, %v4685_v16  ;;  %v556_v11 = vcvt.f32.s32 %v4685_v16 }
 0x409   :  { %v552_v20 = vsel %vm551_vm7, %v547_v18, inf }
 0x40a   :  { %553 = vmin.xlane.f32.xlu0 %v552_v20  ;;  %v557_v13 = vshll.u32 %v556_v11, 16  ;;  %v934_v11 = vld [vmem:[%s5634_s11 + $0x70] sm:$0xff] }
 0x40b   :  { %v4690_v21 = vpop.xlane.xlu0 %526 }
 0x40c   :  { %vm528_vm8 = vcmp.eq.f32.partialorder %v4547_v55, %v4690_v21  ;;  %v664_v55 = vld [vmem:[%s5630_s7 + $0x1c0] sm:$0xff]  ;;  %v533_v18 = vcvt.f32.s32 %v4690_v21 }
 0x40d   :  { %v529_v24 = vsel %vm528_vm8, %v524_v22, inf  ;;  %v3786_v30 = vpack.c.bf16 %v665_v56, %v664_v55 }
 0x40e   :  { %530 = vmin.xlane.f32.xlu0 %v529_v24  ;;  %v534_v23 = vshll.u32 %v533_v18, 16 }
 0x40f   :  { %v4695_v47 = vpop.xlane.xlu1 %595  ;;  %3787 = vmatprep.subr.bf16.mxu0 %v3786_v30 }
 0x410   :  { %vm597_vm9 = vcmp.eq.f32.partialorder %v4557_v59, %v4695_v47  ;;  %v636_v59 = vld [vmem:[%s5630_s7 + $0xe0] sm:$0xff]  ;;  %v602_v24 = vcvt.f32.s32 %v4695_v47 }
 0x411   :  { %v598_v49 = vsel %vm597_vm9, %v593_v26, inf  ;;  %v3762_v32 = vpack.c.bf16 %v637_v31, %v636_v59 }
 0x412   :  { %599 = vmin.xlane.f32.xlu1 %v598_v49 }
 0x413   :  { %v4700_v28 = vpop.xlane.xlu1 %572  ;;  %3763 = vmatprep.subr.bf16.mxu1 %v3762_v32  ;;  %v920_v32 = vld [vmem:[%s5634_s11] sm:$0xff] }
 0x414   :  { %vm574_vm10 = vcmp.eq.f32.partialorder %v4561_v61, %v4700_v28  ;;  %v648_v61 = vld [vmem:[%s5630_s7 + $0x140] sm:$0xff]  ;;  %3765 = vmatpush3.bf16.msra.mxu1 %v3764_v37  ;;  %v925_v37 = vld [vmem:[%s5634_s11 + $0x28] sm:$0xff] }
 0x415   :  { %v575_v57 = vsel %vm574_vm10, %v570_v29, inf  ;;  %v3788_v36 = vpack.c.bf16 %v649_v33, %v648_v61  ;;  %3767 = vmatprep.subr.bf16.mxu1 %v3766_v48  ;;  %v603_v29 = vshll.u32 %v602_v24, 16  ;;  %v924_v33 = vld [vmem:[%s5634_s11 + $0x20] sm:$0xff]  ;;  %v933_v48 = vld [vmem:[%s5634_s11 + $0x68] sm:$0xff] }
 0x416   :  { %576 = vmin.xlane.f32.xlu1 %v575_v57  ;;  %v579_v57 = vcvt.f32.s32 %v4700_v28  ;;  %v835_v28 = vld [vmem:[#allocation2] sm:$0x3f]  ;;  %v3258_v34 = vcombine.low %v920_v32, %v924_v33  ;;  %v3259_v35 = vcombine.high %v920_v32, %v924_v33  ;;  %v3268_v51 = vcombine.low %v929_v44, %v933_v48 }
 0x417   :  { %3789 = vmatpush3.bf16.msra.mxu0 %v3788_v36  ;;  %v921_v36 = vld [vmem:[%s5634_s11 + $0x8] sm:$0xff]  ;;  %v3269_v52 = vcombine.high %v929_v44, %v933_v48 }
 0x418   :  { %3791 = vmatprep.subr.bf16.mxu0 %v3790_v42  ;;  %3769 = vmatpush3.bf16.msra.mxu1 %v3768_v54  ;;  %v580_v56 = vshll.u32 %v579_v57, 16  ;;  %v3261_v38 = vcombine.high %v921_v36, %v925_v37  ;;  %v3260_v39 = vcombine.low %v921_v36, %v925_v37  ;;  %v928_v42 = vld [vmem:[%s5634_s11 + $0x40] sm:$0xff]  ;;  %v926_v54 = vld [vmem:[%s5634_s11 + $0x30] sm:$0xff]  ;;  %v3849_v44 = vld [vmem:[%s5636_s13 + $0x8] ss:$20 sps:$4 sm:$0xff]  }
 0x419   :  { %1019 = vmatprep.subr.bf16.mxu1 %v3259_v35  ;;  %v3267_v45 = vcombine.high %v928_v42, %v932_v43  ;;  %v3266_v50 = vcombine.low %v928_v42, %v932_v43  ;;  %v3846_v42 = vld [vmem:[%s5636_s13] ss:$20 sps:$4 sm:$0xff]   ;;  %v3848_v43 = vld [vmem:[%s5636_s13 + $0x4] ss:$20 sps:$4 sm:$0xff]  }
 0x41a   :  { %v3854_v48 = vld [vmem:[%s5636_s13 + $0x2c] ss:$20 sps:$4 sm:$0xff]  }
 0x41b   :  { %3793 = vmatpush3.bf16.msra.mxu0 %v3792_v53  ;;  %v922_v53 = vld [vmem:[%s5634_s11 + $0x10] sm:$0xff] }
 0x41c   :  { %3795 = vmatprep.subr.bf16.mxu0 %v3794_v62  ;;  %v3262_v60 = vcombine.low %v922_v53, %v926_v54  ;;  %v3263_v62 = vcombine.high %v922_v53, %v926_v54  ;;  %v3860_v53 = vld [vmem:[%s5636_s13 + $0x54] ss:$20 sps:$4 sm:$0xff]   ;;  %v3863_v54 = vld [vmem:[%s5636_s13 + $0x5c] ss:$20 sps:$4 sm:$0xff]  }
 0x41f   :  { %3797 = vmatpush3.bf16.msra.mxu0 %v3796_v2  ;;  %v3265_v2 = vcombine.high %v923_v58, %v927_v63  ;;  %v3858_v58 = vld [vmem:[%s5636_s13 + $0x50] ss:$20 sps:$4 sm:$0xff]  }
 0x420   :  { %3799 = vmatprep.subr.bf16.mxu0 %v3798_v6  ;;  %v3869_v63 = vld [vmem:[%s5636_s13 + $0x84] ss:$20 sps:$4 sm:$0xff]  }
 0x423   :  { %3801 = vmatpush3.bf16.msra.mxu0 %v3800_v10  ;;  %v930_v10 = vld [vmem:[%s5634_s11 + $0x50] sm:$0xff] }
 0x424   :  { %830 = vperm.xlu0 %3827, %v828_v3   ;;  %3673 = vmatprep.subr.mxu0 %v4230_v40  ;;  %v3271_v24 = vcombine.high %v930_v10, %v934_v11 }
 0x497   :  { %v554_v12 = vpop.xlane.xlu0 %553 }
 0x498   :  { %v555_v19 = vcvt.f32.s32 %v554_v12  ;;  %v931_v12 = vld [vmem:[%s5634_s11 + $0x58] sm:$0xff] }
 0x49a   :  { %v4782_v20 = vadd.s32 %v557_v13, %v555_v19  ;;  %v935_v13 = vld [vmem:[%s5634_s11 + $0x78] sm:$0xff] }
 0x49b   :  { %v531_v22 = vpop.xlane.xlu0 %530  ;;  %v3272_v57 = vcombine.low %v931_v12, %v935_v13 }
 0x49c   :  { %v532_v26 = vcvt.f32.s32 %v531_v22  ;;  %vm559_vm11 = vcmp.eq.s32.totalorder %v4530_v41, %v4782_v20 }
 0x49d   :  { %3251 = vmatprep.mubr.msk.f32.mxu1 %vm559_vm11, %v4231_v46 }
 0x49e   :  { %v4787_v49 = vadd.s32 %v534_v23, %v532_v26  ;;  %v3273_v26 = vcombine.high %v931_v12, %v935_v13  ;;  %v3884_v12 = vld [vmem:[%s5636_s13 + $0xf4] ss:$20 sps:$4 sm:$0xff]   ;;  %v3887_v13 = vld [vmem:[%s5636_s13 + $0xfc] ss:$20 sps:$4 sm:$0xff]  }
 0x49f   :  { %v600_v16 = vpop.xlane.xlu1 %599 }
 0x4a0   :  { %vm536_vm12 = vcmp.eq.s32.totalorder %v4530_v41, %v4787_v49  ;;  %v601_v21 = vcvt.f32.s32 %v600_v16  ;;  %v916_v16 = vld [vmem:[#allocation4 + $0x8] sm:$0xff] }
 0x4a1   :  { %3252 = vmatmul.mubr.msk.f32.vlgmr.msra.gmra.mrb[2].mxu1 %vm536_vm12, %v4231_v46 }
 0x4a2   :  { %v4792_v55 = vadd.s32 %v603_v29, %v601_v21  ;;  %1051 = vmatprep.mubr.bf16.mxu1 %v4227_v0  ;;  %1020 = vmatpush1.bf16.msra.mxu1 %v3258_v34  ;;  %v3270_v29 = vcombine.low %v930_v10, %v934_v11  ;;  %v3876_v10 = vld [vmem:[%s5636_s13 + $0xc8] ss:$20 sps:$4 sm:$0xff]   ;;  %v3879_v11 = vld [vmem:[%s5636_s13 + $0xd0] ss:$20 sps:$4 sm:$0xff]  }
 0x4a3   :  { %v577_v47 = vpop.xlane.xlu1 %576  ;;  %v831_v59 = vpop.permute.xlu0 %830  ;;  %1021 = vmatprep.subr.bf16.mxu1 %v3267_v45  ;;  %v3851_v45 = vld [vmem:[%s5636_s13 + $0xc] ss:$20 sps:$4 sm:$0xff]  }
 0x4a4   :  { %v578_v30 = vcvt.f32.s32 %v577_v47  ;;  %vm605_vm13 = vcmp.eq.s32.totalorder %v4530_v41, %v4792_v55  ;;  %vm832_vm15 = vcmp.eq.s32.totalorder %v4530_v41, %v831_v59  ;;  %v917_v59 = vld [vmem:[#allocation4 + $0x10] sm:$0xff] }
 0x4a5   :  { %3253 = vmatprep.mubr.msk.f32.mxu0 %vm605_vm13, %v4231_v46  ;;  %v3255_v61 = vsel %vm832_vm15, 1.0, %v4230_v40  ;;  %v3283_v33 = vcombine.high %v917_v59, %v917_v59  ;;  %v3282_v35 = vcombine.low %v917_v59, %v917_v59  ;;  %v3903_v59 = vld [vmem:[%s5636_s13 + $0x170] ss:$20 sps:$4 sm:$0xff]  }
 0x4a6   :  { %v4797_v31 = vadd.s32 %v580_v56, %v578_v30  ;;  %1022 = vmatpush1.bf16.msra.mxu1 %v3266_v50  ;;  %v3281_v56 = vcombine.high %v916_v16, %v916_v16  ;;  %v3280_v30 = vcombine.low %v916_v16, %v916_v16  ;;  %v3857_v50 = vld [vmem:[%s5636_s13 + $0x34] ss:$20 sps:$4 sm:$0xff]   ;;  %v3896_v16 = vld [vmem:[%s5636_s13 + $0x144] ss:$20 sps:$4 sm:$0xff]  }
 0x4a7   :  { %1101 = vmatprep.subr.bf16.mxu1 %v3263_v62  ;;  %v3866_v62 = vld [vmem:[%s5636_s13 + $0x7c] ss:$20 sps:$4 sm:$0xff]  }
 0x4a8   :  { %vm582_vm3 = vcmp.eq.s32.totalorder %v4530_v41, %v4797_v31  ;;  %v1215_v32 = vsel %vm1207_vm5, %v3280_v30, 0  ;;  %v3900_v30 = vld [vmem:[%s5636_s13 + $0x168] ss:$20 sps:$4 sm:$0xff]  }
 0x4a9   :  { %3254 = vmatmul.mubr.msk.f32.vlgmr.msra.gmra.mrb[8].mxu0 %vm582_vm3, %v4231_v46  ;;  %v915_v46 = vld [vmem:[#allocation4] sm:$0xff] }
 0x4aa   :  { %3674 = vmatpush3.msk.msra.mxu0 %vm840_vm14, %v835_v28  ;;  %3675 = vmatprep.mubr.msk.f32.mxu0 %vm4229_vm1, %v4230_v40  ;;  %v3279_v21 = vcombine.high %v915_v46, %v915_v46  ;;  %v3278_v47 = vcombine.low %v915_v46, %v915_v46  ;;  %v918_v28 = vld [vmem:[#allocation4 + $0x18] sm:$0xff] }
 0x4ab   :  { %1060 = vmatprep.subr.bf16.mxu0 %v3261_v38  ;;  %v3285_v34 = vcombine.high %v918_v28, %v918_v28  ;;  %v3284_v36 = vcombine.low %v918_v28, %v918_v28  ;;  %v1221_v38 = vsel %vm1207_vm5, %v3282_v35, 0  ;;  %v3891_v46 = vld [vmem:[%s5636_s13 + $0x120] ss:$20 sps:$4 sm:$0xff]   ;;  %v3917_v35 = vld [vmem:[%s5636_s13 + $0x1c4] ss:$20 sps:$4 sm:$0xff]  }
 0x4ac   :  { %v3908_v28 = vld [vmem:[%s5636_s13 + $0x194] ss:$20 sps:$4 sm:$0xff]  }
 0x4ad   :  { %3676 = vmatmul.mubr.msk.f32.vlgmr.msra.gmra.mrb[10].mxu0 %vm836_vm4, %v3255_v61  ;;  %v1209_v61 = vsel %vm1207_vm5, %v3278_v47, 0  ;;  %v3902_v47 = vld [vmem:[%s5636_s13 + $0x16c] ss:$20 sps:$4 sm:$0xff]  }
 0x4ae   :  { %1092 = vmatprep.mubr.bf16.mxu0 %v4227_v0  ;;  %1061 = vmatpush1.bf16.msra.mxu0 %v3260_v39  ;;  %v1227_v39 = vsel %vm1207_vm5, %v3284_v36, 0  ;;  %v3912_v36 = vld [vmem:[%s5636_s13 + $0x1b8] ss:$20 sps:$4 sm:$0xff]  }
 0x4af   :  { %1062 = vmatprep.subr.bf16.mxu0 %v3269_v52  ;;  %v3855_v52 = vld [vmem:[%s5636_s13 + $0x30] ss:$20 sps:$4 sm:$0xff]  }
 0x4b2   :  { %1063 = vmatpush1.bf16.msra.mxu0 %v3268_v51  ;;  %v3852_v51 = vld [vmem:[%s5636_s13 + $0x28] ss:$20 sps:$4 sm:$0xff]  }
 0x4b3   :  { %1142 = vmatprep.subr.bf16.mxu0 %v3265_v2  ;;  %v3867_v2 = vld [vmem:[%s5636_s13 + $0x80] ss:$20 sps:$4 sm:$0xff]  }
 0x574   :  { %v3545_v3 = vpop.f32.mrb[2].mxu1 }
 0x575   :  { %v3546_v4 = vpop.f32.mrb[3].mxu1 }
 0x576   :  { %v3547_v5 = vadd.f32 %v3546_v4, %v3545_v3  ;;  %v3872_v3 = vld [vmem:[%s5636_s13 + $0xa4] ss:$20 sps:$4 sm:$0xff]   ;;  %v3875_v4 = vld [vmem:[%s5636_s13 + $0xac] ss:$20 sps:$4 sm:$0xff]  }
 0x57c   :  { %v3580_v6 = vpop.f32.mrb[8].mxu0 }
 0x57d   :  { %v3581_v8 = vpop.f32.mrb[9].mxu0 }
 0x57e   :  { %v3582_v9 = vadd.f32 %v3581_v8, %v3580_v6  ;;  %v3873_v6 = vld [vmem:[%s5636_s13 + $0xa8] ss:$20 sps:$4 sm:$0xff]   ;;  %v3878_v8 = vld [vmem:[%s5636_s13 + $0xcc] ss:$20 sps:$4 sm:$0xff]  }
 0x580   :  { %v4854_v18 = vadd.f32 %v3582_v9, %v3547_v5  ;;  %v910_v19 = vpop.f32.mrb[10].mxu0  ;;  %v3870_v5 = vld [vmem:[%s5636_s13 + $0xa0] ss:$20 sps:$4 sm:$0xff]  }
 0x581   :  { %v3677_v22 = vpop.f32.mrb[11].mxu0  ;;  %v914_v37 = vpack.c.bf16 %v910_v19, %v910_v19  ;;  %v3881_v9 = vld [vmem:[%s5636_s13 + $0xd4] ss:$20 sps:$4 sm:$0xff]   ;;  %v3882_v19 = vld [vmem:[%s5636_s13 + $0xf0] ss:$20 sps:$4 sm:$0xff]  }
 0x582   :  { %v919_v23 = vpack.c.bf16 %v4854_v18, %v4854_v18  ;;  %v3885_v22 = vld [vmem:[%s5636_s13 + $0xf8] ss:$20 sps:$4 sm:$0xff]  }
 0x584   :  { %3274 = vmatmul.mubr.msk.bf16.vlgmr.msra.gmra.mrb[4].mxu1 %vm184_vm0, %v919_v23  ;;  %3275 = vmatmul.mubr.msk.bf16.vlgmr.msra.gmra.mrb[12].mxu0 %vm184_vm0, %v919_v23 }
 0x585   :  { %1102 = vmatpush1.bf16.msra.mxu1 %v3262_v60  ;;  %1143 = vmatpush1.bf16.msra.mxu0 %v3264_v1  ;;  %v3861_v60 = vld [vmem:[%s5636_s13 + $0x58] ss:$20 sps:$4 sm:$0xff]  }
 0x586   :  { %1103 = vmatprep.subr.bf16.mxu1 %v3271_v24  ;;  %1144 = vmatprep.subr.bf16.mxu0 %v3273_v26  ;;  %v3864_v1 = vld [vmem:[%s5636_s13 + $0x78] ss:$20 sps:$4 sm:$0xff]  }
 0x587   :  { %1133 = vmatprep.mubr.bf16.mxu1 %v4227_v0  ;;  %1174 = vmatprep.mubr.bf16.mxu0 %v4227_v0  ;;  %v3893_v24 = vld [vmem:[%s5636_s13 + $0x124] ss:$20 sps:$4 sm:$0xff]  }
 0x588   :  { %v3888_v26 = vld [vmem:[%s5636_s13 + $0x118] ss:$20 sps:$4 sm:$0xff]  }
 0x589   :  { %1104 = vmatpush1.bf16.msra.mxu1 %v3270_v29  ;;  %1145 = vmatpush1.bf16.msra.mxu0 %v3272_v57  ;;  %v3899_v29 = vld [vmem:[%s5636_s13 + $0x14c] ss:$20 sps:$4 sm:$0xff]  }
 0x58a   :  { %3286 = vmatprep.subr.msk.bf16.mxu1 %vm1207_vm5, %v3279_v21  ;;  %3288 = vmatprep.subr.msk.bf16.mxu0 %vm1207_vm5, %v3281_v56  ;;  %v3894_v57 = vld [vmem:[%s5636_s13 + $0x140] ss:$20 sps:$4 sm:$0xff]   ;;  %v3897_v21 = vld [vmem:[%s5636_s13 + $0x148] ss:$20 sps:$4 sm:$0xff]  }
 0x58b   :  { %v3905_v56 = vld [vmem:[%s5636_s13 + $0x174] ss:$20 sps:$4 sm:$0xff]  }
 0x58c   :  { %3276 = vmatmul.mubr.msk.bf16.vlgmr.msra.gmra.mrb[8].mxu1 %vm184_vm0, %v919_v23  ;;  %3277 = vmatmul.mubr.msk.bf16.vlgmr.msra.gmra.mrb[16].mxu0 %vm184_vm0, %v919_v23  ;;  %v3890_v23 = vld [vmem:[%s5636_s13 + $0x11c] ss:$20 sps:$4 sm:$0xff]   ;;  %vm814_vm0 = vcmask 254976  }
 0x58d   :  { %1233 = vmatpush1.bf16.msra.mxu1 %v1209_v61  ;;  %1274 = vmatpush1.bf16.msra.mxu0 %v1215_v32  ;;  %v3911_v61 = vld [vmem:[%s5636_s13 + $0x19c] ss:$20 sps:$4 sm:$0xff]  }
 0x58e   :  { %1264 = vmatprep.mubr.bf16.mxu1 %v4227_v0  ;;  %1305 = vmatprep.mubr.bf16.mxu0 %v4227_v0  ;;  %v3906_v32 = vld [vmem:[%s5636_s13 + $0x190] ss:$20 sps:$4 sm:$0xff]  }
 0x58f   :  { %3290 = vmatprep.subr.msk.bf16.mxu1 %vm1207_vm5, %v3283_v33  ;;  %3292 = vmatprep.subr.msk.bf16.mxu0 %vm1207_vm5, %v3285_v34  ;;  %v3909_v33 = vld [vmem:[%s5636_s13 + $0x198] ss:$20 sps:$4 sm:$0xff]   ;;  %v3914_v34 = vld [vmem:[%s5636_s13 + $0x1bc] ss:$20 sps:$4 sm:$0xff]  }
 0x594   :  { %3287 = vmatmul.mubr.msk.bf16.vlgmr.msra.gmra.mrb[12].mxu1 %vm1203_vm6, %v914_v37  ;;  %3289 = vmatmul.mubr.msk.bf16.vlgmr.msra.gmra.mrb[20].mxu0 %vm1203_vm6, %v914_v37 }
 0x595   :  { %1315 = vmatpush1.bf16.msra.mxu1 %v1221_v38  ;;  %1356 = vmatpush1.bf16.msra.mxu0 %v1227_v39 }
 0x596   :  { %1346 = vmatprep.mubr.bf16.mxu1 %v4227_v0  ;;  %1387 = vmatprep.mubr.bf16.mxu0 %v4227_v0 }
 0x597   :  { %2757 = vmatprep.subr.bf16.mxu1 %v3848_v43  ;;  %2880 = vmatprep.subr.bf16.mxu0 %v3851_v45 }
 0x59c   :  { %3291 = vmatmul.mubr.msk.bf16.vlgmr.msra.gmra.mrb[16].mxu1 %vm1203_vm6, %v914_v37  ;;  %3293 = vmatmul.mubr.msk.bf16.vlgmr.msra.gmra.mrb[24].mxu0 %vm1203_vm6, %v914_v37  ;;  %v3915_v37 = vld [vmem:[%s5636_s13 + $0x1c0] ss:$20 sps:$4 sm:$0xff]  }
 0x59d   :  { %2758 = vmatpush1.bf16.msra.mxu1 %v3846_v42  ;;  %2881 = vmatpush1.bf16.msra.mxu0 %v3849_v44 }
 0x59e   :  { %2759 = vmatprep.subr.bf16.mxu1 %v3854_v48  ;;  %2882 = vmatprep.subr.bf16.mxu0 %v3857_v50 }
 0x5a1   :  { %2760 = vmatpush1.bf16.msra.mxu1 %v3852_v51  ;;  %2883 = vmatpush1.bf16.msra.mxu0 %v3855_v52 }
 0x5a2   :  { %2761 = vmatprep.subr.bf16.mxu1 %v3860_v53  ;;  %2884 = vmatprep.subr.bf16.mxu0 %v3863_v54 }
 0x5a5   :  { %2762 = vmatpush1.bf16.msra.mxu1 %v3858_v58  ;;  %2885 = vmatpush1.bf16.msra.mxu0 %v3861_v60 }
 0x5a6   :  { %2763 = vmatprep.subr.bf16.mxu1 %v3866_v62  ;;  %2886 = vmatprep.subr.bf16.mxu0 %v3869_v63 }
 0x5a9   :  { %2764 = vmatpush1.bf16.msra.mxu1 %v3864_v1  ;;  %2887 = vmatpush1.bf16.msra.mxu0 %v3867_v2 }
 0x5aa   :  { %2765 = vmatprep.subr.bf16.mxu1 %v3872_v3  ;;  %2888 = vmatprep.subr.bf16.mxu0 %v3875_v4  ;;  %v1396_v4 = vld [vmem:[#allocation6] sm:$0xff] }
 0x5ad   :  { %2766 = vmatpush1.bf16.msra.mxu1 %v3870_v5  ;;  %2889 = vmatpush1.bf16.msra.mxu0 %v3873_v6 }
 0x5ae   :  { %2767 = vmatprep.subr.bf16.mxu1 %v3878_v8  ;;  %2890 = vmatprep.subr.bf16.mxu0 %v3881_v9 }
 0x5b1   :  { %2768 = vmatpush1.bf16.msra.mxu1 %v3876_v10  ;;  %2891 = vmatpush1.bf16.msra.mxu0 %v3879_v11 }
 0x5b2   :  { %2769 = vmatprep.subr.bf16.mxu1 %v3884_v12  ;;  %2892 = vmatprep.subr.bf16.mxu0 %v3887_v13 }
 0x5b5   :  { %2770 = vmatpush1.bf16.msra.mxu1 %v3882_v19  ;;  %2893 = vmatpush1.bf16.msra.mxu0 %v3885_v22  ;;  %v1416_v22 = vsub.s32 4, %v4509_v14 }
 0x5b6   :  { %2771 = vmatprep.subr.bf16.mxu1 %v3890_v23  ;;  %2894 = vmatprep.subr.bf16.mxu0 %v3893_v24  ;;  %v1424_v23 = vsub.s32 6, %v4509_v14  ;;  %v1401_v24 = vrot.slane %v1396_v4, %v491_v15 }
 0x5b9   :  { %2772 = vmatpush1.bf16.msra.mxu1 %v3888_v26  ;;  %2895 = vmatpush1.bf16.msra.mxu0 %v3891_v46  ;;  %v1420_v26 = vsub.s32 5, %v4509_v14  ;;  %v1428_v46 = vsub.s32 7, %v4509_v14 }
 0x5ba   :  { %2773 = vmatprep.subr.bf16.mxu1 %v3896_v16  ;;  %2896 = vmatprep.subr.bf16.mxu0 %v3899_v29  ;;  %v1409_v16 = vrot.slane %v1396_v4, %v499_v25  ;;  %v1413_v29 = vrot.slane %v1396_v4, %v503_v27 }
 0x5bb   :  { %v1421_v15 = vrot.slane %v1396_v4, %v1420_v26  ;;  %v3924_v26 = vld [vmem:[%s5636_s13 + $0x208] ss:$20 sps:$4 sm:$0xff]  }
 0x5bd   :  { %2774 = vmatpush1.bf16.msra.mxu1 %v3894_v57  ;;  %2897 = vmatpush1.bf16.msra.mxu0 %v3897_v21  ;;  %v1405_v57 = vrot.slane %v1396_v4, %v495_v17  ;;  %v1417_v21 = vrot.slane %v1396_v4, %v1416_v22 }
 0x5be   :  { %2775 = vmatprep.subr.bf16.mxu1 %v3902_v47  ;;  %2898 = vmatprep.subr.bf16.mxu0 %v3905_v56  ;;  %v1425_v47 = vrot.slane %v1396_v4, %v1424_v23  ;;  %v3929_v23 = vld [vmem:[%s5636_s13 + $0x214] ss:$20 sps:$4 sm:$0xff]  }
 0x5c1   :  { %2776 = vmatpush1.bf16.msra.mxu1 %v3900_v30  ;;  %2899 = vmatpush1.bf16.msra.mxu0 %v3903_v59 }
 0x5c2   :  { %2777 = vmatprep.subr.bf16.mxu1 %v3908_v28  ;;  %2900 = vmatprep.subr.bf16.mxu0 %v3911_v61  ;;  %v1429_v28 = vrot.slane %v1396_v4, %v1428_v46 }
 0x5c5   :  { %2778 = vmatpush1.bf16.msra.mxu1 %v3906_v32  ;;  %2901 = vmatpush1.bf16.msra.mxu0 %v3909_v33 }
 0x5c6   :  { %2779 = vmatprep.subr.bf16.mxu1 %v3914_v34  ;;  %2902 = vmatprep.subr.bf16.mxu0 %v3917_v35 }
 0x5c9   :  { %2780 = vmatpush1.bf16.msra.mxu1 %v3912_v36  ;;  %2903 = vmatpush1.bf16.msra.mxu0 %v3915_v37 }
 0x657   :  { %v1053_v38 = vpop.f32.mrb[4].mxu1  ;;  %v1094_v39 = vpop.f32.mrb[12].mxu0 }
 0x658   :  { %v1055_v42 = vpop.f32.mrb[5].mxu1  ;;  %v1096_v43 = vpop.f32.mrb[13].mxu0 }
 0x659   :  { %v1057_v44 = vpop.f32.mrb[6].mxu1  ;;  %v1098_v45 = vpop.f32.mrb[14].mxu0 }
 0x65a   :  { %v1058_v48 = vpop.f32.mrb[7].mxu1  ;;  %v1099_v50 = vpop.f32.mrb[15].mxu0 }
 0x65f   :  { %v1135_v51 = vpop.f32.mrb[8].mxu1  ;;  %v1176_v52 = vpop.f32.mrb[16].mxu0 }
 0x660   :  { %v1137_v53 = vpop.f32.mrb[9].mxu1  ;;  %v1178_v54 = vpop.f32.mrb[17].mxu0 }
 0x661   :  { %v1139_v58 = vpop.f32.mrb[10].mxu1  ;;  %v1180_v60 = vpop.f32.mrb[18].mxu0 }
 0x662   :  { %v1140_v62 = vpop.f32.mrb[11].mxu1  ;;  %v1181_v63 = vpop.f32.mrb[19].mxu0 }
 0x663   :  { %v812_v62 = vsub.f32 %v4854_v18, %v4496_v7  ;;  %v3920_v7 = vld [vmem:[%s5636_s13 + $0x1e4] ss:$20 sps:$4 sm:$0xff]   ;;  %v3923_v18 = vld [vmem:[%s5636_s13 + $0x1ec] ss:$20 sps:$4 sm:$0xff]  }
 0x664   :  { %2781 = vmatprep.subr.bf16.mxu1 %v3920_v7  ;;  %2904 = vmatprep.subr.bf16.mxu0 %v3923_v18  ;;  %v3950_v7 = vld [vmem:[%s5636_s13 + $0x2ac] ss:$20 sps:$4 sm:$0xff]   ;;  %v3953_v18 = vld [vmem:[%s5636_s13 + $0x2b4] ss:$20 sps:$4 sm:$0xff]  }
 0x667   :  { %v1266_v1 = vpop.f32.mrb[12].mxu1  ;;  %v1307_v2 = vpop.f32.mrb[20].mxu0 }
 0x668   :  { %v1267_v3 = vadd.f32 %v1266_v1, %v1053_v38  ;;  %v1308_v5 = vadd.f32 %v1307_v2, %v1094_v39  ;;  %v1268_v6 = vpop.f32.mrb[13].mxu1  ;;  %v1309_v8 = vpop.f32.mrb[21].mxu0 }
 0x669   :  { %v1269_v9 = vadd.f32 %v1268_v6, %v1055_v42  ;;  %v1310_v10 = vadd.f32 %v1309_v8, %v1096_v43  ;;  %v1270_v11 = vpop.f32.mrb[14].mxu1  ;;  %v1311_v12 = vpop.f32.mrb[22].mxu0  ;;  %v5059_v8 = vadd.s32 128, %v4530_v41 }
 0x66a   :  { %v1271_v13 = vpop.f32.mrb[15].mxu1  ;;  %v1312_v19 = vpop.f32.mrb[23].mxu0  ;;  %v5032_v56 = vadd.f32 %v1401_v24, %v1267_v3  ;;  %v5034_v61 = vadd.f32 %v1409_v16, %v1308_v5  ;;  %v813_v3 = vmul.f32 %v812_v62, %v812_v62  ;;  %v3157_v11 = vcvt.s32.f32 %v4787_v49  ;;  %v3926_v49 = vld [vmem:[%s5636_s13 + $0x20c] ss:$20 sps:$4 sm:$0xff]  }
 0x66b   :  { %v5036_v32 = vadd.f32 %v1413_v29, %v1310_v10  ;;  %v5038_v38 = vadd.f32 %v1405_v57, %v1269_v9  ;;  %vm3152_vm7 = vcmp.lt.s32.totalorder %v5059_v8, 160  ;;  %v3918_v9 = vld [vmem:[%s5636_s13 + $0x1e0] ss:$20 sps:$4 sm:$0xff]   ;;  %v3921_v10 = vld [vmem:[%s5636_s13 + $0x1e8] ss:$20 sps:$4 sm:$0xff]   ;;  %vm3156_vm8 = vcmp.eq.s32.totalorder %v5059_v8, 160 }
 0x66c   :  { %v1446_v50 = vsel %vm515_vm2, %v5032_v56, -inf  ;;  %v815_v4 = vsel %vm814_vm0, %v813_v3, 0.0  ;;  %vm3161_vm9 = vcmp.eq.s32.totalorder %v5059_v8, 161  ;;  %v3162_v12 = vcvt.s32.f32 %v4782_v20  ;;  %2782 = vmatpush1.bf16.msra.mxu1 %v3918_v9  ;;  %2905 = vmatpush1.bf16.msra.mxu0 %v3921_v10  ;;  %v3935_v29 = vld [vmem:[%s5636_s13 + $0x23c] ss:$20 sps:$4 sm:$0xff]  }
 0x66d   :  { %v1447_v60 = vsel %vm515_vm2, %v5038_v38, -inf  ;;  %vm3166_vm10 = vcmp.eq.s32.totalorder %v5059_v8, 162  ;;  %v3167_v19 = vcvt.s32.f32 %v4797_v31  ;;  %vm3171_vm11 = vcmp.eq.s32.totalorder %v5059_v8, 163  ;;  %2783 = vmatprep.subr.bf16.mxu1 %v3926_v49  ;;  %v3927_v31 = vld [vmem:[%s5636_s13 + $0x210] ss:$20 sps:$4 sm:$0xff]   ;;  %2906 = vmatprep.subr.bf16.mxu0 %v3929_v23 }
 0x66e   :  { %v3172_v20 = vcvt.s32.f32 %v4792_v55  ;;  %v3932_v55 = vld [vmem:[%s5636_s13 + $0x234] ss:$20 sps:$4 sm:$0xff]   ;;  %v3930_v57 = vld [vmem:[%s5636_s13 + $0x230] ss:$20 sps:$4 sm:$0xff]  }
 0x66f   :  { %v1348_v30 = vpop.f32.mrb[16].mxu1  ;;  %v1389_v59 = vpop.f32.mrb[24].mxu0  ;;  %v3942_v3 = vld [vmem:[%s5636_s13 + $0x280] ss:$20 sps:$4 sm:$0xff]   ;;  %v3954_v23 = vld [vmem:[%s5636_s13 + $0x2d0] ss:$20 sps:$4 sm:$0xff]  }
 0x670   :  { %v1349_v33 = vadd.f32 %v1348_v30, %v1135_v51  ;;  %v1390_v25 = vadd.f32 %v1389_v59, %v1176_v52  ;;  %v1350_v34 = vpop.f32.mrb[17].mxu1  ;;  %v1391_v35 = vpop.f32.mrb[25].mxu0  ;;  %v1448_v52 = vsel %vm515_vm2, %v5034_v61, -inf  ;;  %2784 = vmatpush1.bf16.msra.mxu1 %v3924_v26  ;;  %2907 = vmatpush1.bf16.msra.mxu0 %v3927_v31  ;;  %v3941_v30 = vld [vmem:[%s5636_s13 + $0x264] ss:$20 sps:$4 sm:$0xff]  }
 0x671   :  { %v1351_v27 = vadd.f32 %v1350_v34, %v1137_v53  ;;  %v1392_v36 = vadd.f32 %v1391_v35, %v1178_v54  ;;  %v1352_v37 = vpop.f32.mrb[18].mxu1  ;;  %v1393_v17 = vpop.f32.mrb[26].mxu0  ;;  %v1449_v53 = vsel %vm515_vm2, %v5036_v32, -inf  ;;  %2785 = vmatprep.subr.bf16.mxu1 %v3932_v55  ;;  %2908 = vmatprep.subr.bf16.mxu0 %v3935_v29  ;;  %v3936_v59 = vld [vmem:[%s5636_s13 + $0x258] ss:$20 sps:$4 sm:$0xff]  }
 0x672   :  { %v5040_v39 = vadd.f32 %v1417_v21, %v1349_v33  ;;  %v5042_v42 = vadd.f32 %v1425_v47, %v1390_v25  ;;  %v1353_v43 = vpop.f32.mrb[19].mxu1  ;;  %v1394_v44 = vpop.f32.mrb[27].mxu0  ;;  %v1453_v1 = vmax.f32 %v1448_v52, %v1449_v53  ;;  %v3933_v21 = vld [vmem:[%s5636_s13 + $0x238] ss:$20 sps:$4 sm:$0xff]   ;;  %v3938_v47 = vld [vmem:[%s5636_s13 + $0x25c] ss:$20 sps:$4 sm:$0xff]  }
 0x673   :  { %v5044_v45 = vadd.f32 %v1421_v15, %v1351_v27  ;;  %v1445_v48 = vadd.f32 %v1429_v28, %v1392_v36  ;;  %v3939_v15 = vld [vmem:[%s5636_s13 + $0x260] ss:$20 sps:$4 sm:$0xff]   ;;  %v3944_v28 = vld [vmem:[%s5636_s13 + $0x284] ss:$20 sps:$4 sm:$0xff]  }
 0x674   :  { %v1450_v51 = vsel %vm515_vm2, %v5040_v39, -inf  ;;  %2786 = vmatpush1.bf16.msra.mxu1 %v3930_v57  ;;  %2909 = vmatpush1.bf16.msra.mxu0 %v3933_v21  ;;  %v3947_v33 = vld [vmem:[%s5636_s13 + $0x28c] ss:$20 sps:$4 sm:$0xff]   ;;  %v3494_v25 = vmul.f32 -1.442695, %v5042_v42 }
 0x675   :  { %v3495_v54 = vmul.f32 -1.442695, %v1445_v48  ;;  %v1451_v58 = vmax.f32 %v1446_v50, %v1450_v51  ;;  %2787 = vmatprep.subr.bf16.mxu1 %v3938_v47  ;;  %2910 = vmatprep.subr.bf16.mxu0 %v3941_v30  ;;  %v3965_v26 = vld [vmem:[%s5636_s13 + $0x304] ss:$20 sps:$4 sm:$0xff]   ;;  %v3963_v31 = vld [vmem:[%s5636_s13 + $0x300] ss:$20 sps:$4 sm:$0xff]  }
 0x676   :  { %v3971_v55 = vld [vmem:[%s5636_s13 + $0x32c] ss:$20 sps:$4 sm:$0xff]   ;;  %v3969_v57 = vld [vmem:[%s5636_s13 + $0x328] ss:$20 sps:$4 sm:$0xff]  }
 0x677   :  { %4126 = vpow2.f32 %v3495_v54  ;;  %v1452_v63 = vmax.f32 %v1451_v58, %v1447_v60  ;;  %v3966_v29 = vld [vmem:[%s5636_s13 + $0x320] ss:$20 sps:$4 sm:$0xff]   ;;  %v3972_v30 = vld [vmem:[%s5636_s13 + $0x348] ss:$20 sps:$4 sm:$0xff]  }
 0x678   :  { %2788 = vmatpush1.bf16.msra.mxu1 %v3936_v59  ;;  %2911 = vmatpush1.bf16.msra.mxu0 %v3939_v15  ;;  %v3974_v21 = vld [vmem:[%s5636_s13 + $0x34c] ss:$20 sps:$4 sm:$0xff]   ;;  %v3977_v47 = vld [vmem:[%s5636_s13 + $0x354] ss:$20 sps:$4 sm:$0xff]   ;;  %v3975_v59 = vld [vmem:[%s5636_s13 + $0x350] ss:$20 sps:$4 sm:$0xff]  }
 0x679   :  { %v1454_v2 = vmax.f32 %v1452_v63, %v1453_v1  ;;  %2798 = vmatprep.subr.bf16.mxu1 %v3944_v28  ;;  %2921 = vmatprep.subr.bf16.mxu0 %v3947_v33  ;;  %v3980_v15 = vld [vmem:[%s5636_s13 + $0x374] ss:$20 sps:$4 sm:$0xff]   ;;  %v3983_v28 = vld [vmem:[%s5636_s13 + $0x37c] ss:$20 sps:$4 sm:$0xff]  }
 0x67a   :  { %v3978_v33 = vld [vmem:[%s5636_s13 + $0x370] ss:$20 sps:$4 sm:$0xff]  }
 0x67b   :  { %1455 = vmax.xlane.f32.xlu1 %v1454_v2 }
 0x67f   :  { %816 = vadd.xlane.f32.xlu1 %v815_v4  ;;  %v3945_v4 = vld [vmem:[%s5636_s13 + $0x288] ss:$20 sps:$4 sm:$0xff]  }
 0x681   :  { %v4127_v5 = vpop.eup %4126 }
 0x682   :  { %v3145_v6 = vadd.f32 1.0, %v4127_v5 }
 0x684   :  { %4128 = vrcp.f32 %v3145_v6 }
 0x685   :  { %4130 = vpow2.f32 %v3494_v25  ;;  %v3981_v25 = vld [vmem:[%s5636_s13 + $0x378] ss:$20 sps:$4 sm:$0xff]  }
 0x68e   :  { %v4129_v41 = vpop.eup %4128 }
 0x68f   :  { %v3154_v13 = vsel %vm3152_vm7, %v4129_v41, 0.0  ;;  %v4131_v48 = vpop.eup %4130  ;;  %v3948_v41 = vld [vmem:[%s5636_s13 + $0x2a8] ss:$20 sps:$4 sm:$0xff]  }
 0x690   :  { %v3159_v22 = vsel %vm3156_vm8, %v3157_v11, %v3154_v13  ;;  %v3144_v51 = vadd.f32 1.0, %v4131_v48  ;;  %v3951_v11 = vld [vmem:[%s5636_s13 + $0x2b0] ss:$20 sps:$4 sm:$0xff]   ;;  %v3993_v48 = vld [vmem:[%s5636_s13 + $0x3c8] ss:$20 sps:$4 sm:$0xff]  }
 0x691   :  { %v3164_v24 = vsel %vm3161_vm9, %v3162_v12, %v3159_v22 }
 0x692   :  { %v3169_v46 = vsel %vm3166_vm10, %v3167_v19, %v3164_v24  ;;  %v3959_v19 = vld [vmem:[%s5636_s13 + $0x2dc] ss:$20 sps:$4 sm:$0xff]  }
 0x693   :  { %v5094_v16 = vsel %vm3171_vm11, %v3172_v20, %v3169_v46  ;;  %v3957_v20 = vld [vmem:[%s5636_s13 + $0x2d8] ss:$20 sps:$4 sm:$0xff]   ;;  %v3962_v24 = vld [vmem:[%s5636_s13 + $0x2fc] ss:$20 sps:$4 sm:$0xff]  }
 0x694   :  { %v3960_v46 = vld [vmem:[%s5636_s13 + $0x2f8] ss:$20 sps:$4 sm:$0xff]  }
 0x708   :  { %v5127_v34 = vpop.xlane.xlu1 %1455 }
 0x709   :  { %v1457_v35 = vsub.f32 %v5032_v56, %v5127_v34  ;;  %v1458_v27 = vsub.f32 %v5038_v38, %v5127_v34  ;;  %v1460_v36 = vsub.f32 %v5036_v32, %v5127_v34  ;;  %v4232_v38 = vmov 1983009808  }
 0x70a   :  { %v3190_v54 = vunpack.c.l.s4 %v4232_v38  ;;  %v4002_v38 = vld [vmem:[%s5636_s13 + $0x410] ss:$20 sps:$4 sm:$0xff]  }
 0x70b   :  { %v1462_v37 = vmul.f32 1.442695, %v1457_v35  ;;  %v1464_v17 = vmul.f32 1.442695, %v1458_v27  ;;  %v1468_v43 = vmul.f32 1.442695, %v1460_v36 }
 0x70c   :  { %v817_v44 = vpop.xlane.xlu1 %816  ;;  %v3191_v1 = vunpack.c.0.s8 %v3190_v54  ;;  %v3986_v35 = vld [vmem:[%s5636_s13 + $0x39c] ss:$20 sps:$4 sm:$0xff]   ;;  %v3989_v27 = vld [vmem:[%s5636_s13 + $0x3a4] ss:$20 sps:$4 sm:$0xff]  }
 0x70d   :  { %4132 = vpow2.f32 %v1462_v37  ;;  %v818_v42 = vsel %vm515_vm2, %v817_v44, 0.0  ;;  %vm3176_vm2 = vcmp.eq.s32.totalorder %v5059_v8, 164  ;;  %v3984_v36 = vld [vmem:[%s5636_s13 + $0x398] ss:$20 sps:$4 sm:$0xff]   ;;  %v3987_v37 = vld [vmem:[%s5636_s13 + $0x3a0] ss:$20 sps:$4 sm:$0xff]  }
 0x70e   :  { %4134 = vpow2.f32 %v1464_v17  ;;  %v819_v50 = vrot.slane %v818_v42, 4  ;;  %v5172_v10 = vsub.s32 %v3191_v1, %v4509_v14  ;;  %v3956_v14 = vld [vmem:[%s5636_s13 + $0x2d4] ss:$20 sps:$4 sm:$0xff]   ;;  %v3992_v17 = vld [vmem:[%s5636_s13 + $0x3c4] ss:$20 sps:$4 sm:$0xff]   ;;  %v1459_v1 = vsub.f32 %v5034_v61, %v5127_v34 }
 0x70f   :  { %4136 = vpow2.f32 %v1468_v43  ;;  %v3995_v43 = vld [vmem:[%s5636_s13 + $0x3cc] ss:$20 sps:$4 sm:$0xff]  }
 0x710   :  { %v820_v52 = vadd.f32 %v819_v50, %v818_v42  ;;  %4138 = vrcp.f32 %v3144_v51  ;;  %v3990_v44 = vld [vmem:[%s5636_s13 + $0x3c0] ss:$20 sps:$4 sm:$0xff]   ;;  %v3996_v51 = vld [vmem:[%s5636_s13 + $0x3e8] ss:$20 sps:$4 sm:$0xff]   ;;  %v4005_v54 = vld [vmem:[%s5636_s13 + $0x418] ss:$20 sps:$4 sm:$0xff]  }
 0x711   :  { %v3998_v42 = vld [vmem:[%s5636_s13 + $0x3ec] ss:$20 sps:$4 sm:$0xff]   ;;  %v4001_v50 = vld [vmem:[%s5636_s13 + $0x3f4] ss:$20 sps:$4 sm:$0xff]  }
 0x712   :  { %v821_v56 = vrot.slane %v820_v52, 2  ;;  %v4019_v61 = vld [vmem:[%s5636_s13 + $0x46c] ss:$20 sps:$4 sm:$0xff]  }
 0x714   :  { %v822_v53 = vadd.f32 %v821_v56, %v820_v52  ;;  %v3999_v52 = vld [vmem:[%s5636_s13 + $0x3f0] ss:$20 sps:$4 sm:$0xff]   ;;  %v4004_v56 = vld [vmem:[%s5636_s13 + $0x414] ss:$20 sps:$4 sm:$0xff]  }
 0x716   :  { %v823_v58 = vrot.slane %v822_v53, 1 }
 0x717   :  { %v5136_v32 = vpop.eup %4132 }
 0x718   :  { %v5138_v60 = vpop.eup %4134  ;;  %v824_v62 = vadd.f32 %v823_v58, %v822_v53  ;;  %v5142_v63 = vpack.c.bf16 %v5136_v32, %v5136_v32  ;;  %v4007_v53 = vld [vmem:[%s5636_s13 + $0x41c] ss:$20 sps:$4 sm:$0xff]  }
 0x719   :  { %v5146_v2 = vpack.c.bf16 %v5138_v60, %v5138_v60  ;;  %v5154_v5 = vpop.eup %4136  ;;  %v4010_v58 = vld [vmem:[%s5636_s13 + $0x43c] ss:$20 sps:$4 sm:$0xff]  }
 0x71a   :  { %v825_v6 = vmul.f32 1.25, %v824_v62  ;;  %v5169_v8 = vpack.c.bf16 %v5154_v5, %v5154_v5  ;;  %v4139_v12 = vpop.eup %4138  ;;  %v4013_v62 = vld [vmem:[%s5636_s13 + $0x444] ss:$20 sps:$4 sm:$0xff]  }
 0x71b   :  { %2789 = vmatprep.mubr.bf16.mxu1 %v5146_v2  ;;  %2912 = vmatprep.mubr.bf16.mxu0 %v5146_v2 }
 0x71c   :  { %v827_v9 = vmul.f32 0.015625, %v825_v6  ;;  %2790 = vmatmul.mubr.bf16.vlgmr.msra.gmra.mrb[20].mxu1 %v5142_v63  ;;  %2913 = vmatmul.mubr.bf16.vlgmr.msra.gmra.mrb[28].mxu0 %v5142_v63  ;;  %v4016_v6 = vld [vmem:[%s5636_s13 + $0x464] ss:$20 sps:$4 sm:$0xff]  }
 0x71d   :  { %2799 = vmatpush1.bf16.msra.mxu1 %v3942_v3  ;;  %2922 = vmatpush1.bf16.msra.mxu0 %v3945_v4  ;;  %v4008_v3 = vld [vmem:[%s5636_s13 + $0x438] ss:$20 sps:$4 sm:$0xff]   ;;  %v4011_v4 = vld [vmem:[%s5636_s13 + $0x440] ss:$20 sps:$4 sm:$0xff]  }
 0x71e   :  { %v3178_v13 = vsel %vm3176_vm2, %v827_v9, %v5094_v16  ;;  %2830 = vmatprep.mubr.bf16.mxu1 %v5169_v8  ;;  %2953 = vmatprep.mubr.bf16.mxu0 %v5169_v8  ;;  %v3968_v16 = vld [vmem:[%s5636_s13 + $0x324] ss:$20 sps:$4 sm:$0xff]   ;;  %v4017_v9 = vld [vmem:[%s5636_s13 + $0x468] ss:$20 sps:$4 sm:$0xff]  }
 0x71f   :  { %v3205_v22 = vcombine.low %v4139_v12, %v3178_v13  ;;  %2800 = vmatprep.subr.bf16.mxu1 %v3950_v7  ;;  %2923 = vmatprep.subr.bf16.mxu0 %v3953_v18  ;;  %v1466_v7 = vmul.f32 1.442695, %v1459_v1  ;;  %v4014_v18 = vld [vmem:[%s5636_s13 + $0x460] ss:$20 sps:$4 sm:$0xff]   ;;  %v4020_v12 = vld [vmem:[%s5636_s13 + $0x488] ss:$20 sps:$4 sm:$0xff]  }
 0x720   :  { %v4023_v13 = vld [vmem:[%s5636_s13 + $0x490] ss:$20 sps:$4 sm:$0xff]   ;;  %v4080_v1 = vld [vmem:[%s5636_s13 + $0x618] ss:$20 sps:$4 sm:$0xff]  }
 0x721   :  { %v5190_v49 = vrot.slane %v3205_v22, %v5172_v10  ;;  %2801 = vmatpush1.bf16.msra.mxu1 %v3948_v41  ;;  %2924 = vmatpush1.bf16.msra.mxu0 %v3951_v11  ;;  %v4022_v41 = vld [vmem:[%s5636_s13 + $0x48c] ss:$20 sps:$4 sm:$0xff]   ;;  %v4025_v11 = vld [vmem:[%s5636_s13 + $0x494] ss:$20 sps:$4 sm:$0xff]   ;;  %4140 = vpow2.f32 %v1466_v7  ;;  %v4026_v22 = vld [vmem:[%s5636_s13 + $0x4b0] ss:$20 sps:$4 sm:$0xff]  }
 0x722   :  { %2802 = vmatprep.subr.bf16.mxu1 %v3956_v14  ;;  %2925 = vmatprep.subr.bf16.mxu0 %v3959_v19  ;;  %v4028_v14 = vld [vmem:[%s5636_s13 + $0x4b4] ss:$20 sps:$4 sm:$0xff]   ;;  %v4031_v19 = vld [vmem:[%s5636_s13 + $0x4bc] ss:$20 sps:$4 sm:$0xff]  }
 0x723   :  { %v4088_v7 = vld [vmem:[%s5636_s13 + $0x10] ss:$20 sps:$4 sm:$0xff]  }
 0x725   :  { %2803 = vmatpush1.bf16.msra.mxu1 %v3954_v23  ;;  %2926 = vmatpush1.bf16.msra.mxu0 %v3957_v20  ;;  %v4029_v23 = vld [vmem:[%s5636_s13 + $0x4b8] ss:$20 sps:$4 sm:$0xff]   ;;  %v4034_v20 = vld [vmem:[%s5636_s13 + $0x4dc] ss:$20 sps:$4 sm:$0xff]  }
 0x726   :  { %2804 = vmatprep.subr.bf16.mxu1 %v3962_v24  ;;  %2927 = vmatprep.subr.bf16.mxu0 %v3965_v26  ;;  %v4037_v24 = vld [vmem:[%s5636_s13 + $0x4e4] ss:$20 sps:$4 sm:$0xff]  }
 0x727   :  { %v4032_v26 = vld [vmem:[%s5636_s13 + $0x4d8] ss:$20 sps:$4 sm:$0xff]  }
 0x729   :  { %2805 = vmatpush1.bf16.msra.mxu1 %v3960_v46  ;;  %2928 = vmatpush1.bf16.msra.mxu0 %v3963_v31  ;;  %v4035_v46 = vld [vmem:[%s5636_s13 + $0x4e0] ss:$20 sps:$4 sm:$0xff]   ;;  %v4040_v31 = vld [vmem:[%s5636_s13 + $0x504] ss:$20 sps:$4 sm:$0xff]  }
 0x72a   :  { %2806 = vmatprep.subr.bf16.mxu1 %v3968_v16  ;;  %2929 = vmatprep.subr.bf16.mxu0 %v3971_v55  ;;  %v4043_v16 = vld [vmem:[%s5636_s13 + $0x50c] ss:$20 sps:$4 sm:$0xff]  }
 0x72b   :  { %v5362_v55 = vpop.eup %4140 }
 0x72d   :  { %2807 = vmatpush1.bf16.msra.mxu1 %v3966_v29  ;;  %2930 = vmatpush1.bf16.msra.mxu0 %v3969_v57  ;;  %v4038_v29 = vld [vmem:[%s5636_s13 + $0x500] ss:$20 sps:$4 sm:$0xff]   ;;  %v4041_v57 = vld [vmem:[%s5636_s13 + $0x508] ss:$20 sps:$4 sm:$0xff]  }
 0x72e   :  { %2808 = vmatprep.subr.bf16.mxu1 %v3974_v21  ;;  %2931 = vmatprep.subr.bf16.mxu0 %v3977_v47  ;;  %v5372_v21 = vpack.c.bf16 %v5362_v55, %v5362_v55  ;;  %v4046_v47 = vld [vmem:[%s5636_s13 + $0x52c] ss:$20 sps:$4 sm:$0xff]  }
 0x731   :  { %2809 = vmatpush1.bf16.msra.mxu1 %v3972_v30  ;;  %2932 = vmatpush1.bf16.msra.mxu0 %v3975_v59  ;;  %v4049_v30 = vld [vmem:[%s5636_s13 + $0x534] ss:$20 sps:$4 sm:$0xff]  }
 0x732   :  { %2810 = vmatprep.subr.bf16.mxu1 %v3980_v15  ;;  %2933 = vmatprep.subr.bf16.mxu0 %v3983_v28  ;;  %v4044_v59 = vld [vmem:[%s5636_s13 + $0x528] ss:$20 sps:$4 sm:$0xff]   ;;  %v4047_v15 = vld [vmem:[%s5636_s13 + $0x530] ss:$20 sps:$4 sm:$0xff]  }
 0x733   :  { %v4052_v28 = vld [vmem:[%s5636_s13 + $0x554] ss:$20 sps:$4 sm:$0xff]  }
 0x735   :  { %2811 = vmatpush1.bf16.msra.mxu1 %v3978_v33  ;;  %2934 = vmatpush1.bf16.msra.mxu0 %v3981_v25  ;;  %v4055_v33 = vld [vmem:[%s5636_s13 + $0x55c] ss:$20 sps:$4 sm:$0xff]  }
 0x736   :  { %2812 = vmatprep.subr.bf16.mxu1 %v3986_v35  ;;  %2935 = vmatprep.subr.bf16.mxu0 %v3989_v27  ;;  %v4050_v25 = vld [vmem:[%s5636_s13 + $0x550] ss:$20 sps:$4 sm:$0xff]   ;;  %v4053_v35 = vld [vmem:[%s5636_s13 + $0x558] ss:$20 sps:$4 sm:$0xff]  }
 0x737   :  { %v4058_v27 = vld [vmem:[%s5636_s13 + $0x57c] ss:$20 sps:$4 sm:$0xff]  }
 0x739   :  { %2813 = vmatpush1.bf16.msra.mxu1 %v3984_v36  ;;  %2936 = vmatpush1.bf16.msra.mxu0 %v3987_v37  ;;  %v1461_v36 = vsub.f32 %v5040_v39, %v5127_v34  ;;  %v4056_v37 = vld [vmem:[%s5636_s13 + $0x578] ss:$20 sps:$4 sm:$0xff]  }
 0x73a   :  { %2814 = vmatprep.subr.bf16.mxu1 %v3992_v17  ;;  %2937 = vmatprep.subr.bf16.mxu0 %v3995_v43  ;;  %v4059_v17 = vld [vmem:[%s5636_s13 + $0x580] ss:$20 sps:$4 sm:$0xff]   ;;  %v4064_v43 = vld [vmem:[%s5636_s13 + $0x5a4] ss:$20 sps:$4 sm:$0xff]  }
 0x73b   :  { %v4067_v39 = vld [vmem:[%s5636_s13 + $0x5ac] ss:$20 sps:$4 sm:$0xff]   ;;  %v1470_v34 = vmul.f32 1.442695, %v1461_v36  ;;  %v4118_v36 = vld [vmem:[%s5636_s13 + $0x510] ss:$20 sps:$4 sm:$0xff]  }
 0x73d   :  { %2815 = vmatpush1.bf16.msra.mxu1 %v3990_v44  ;;  %2938 = vmatpush1.bf16.msra.mxu0 %v3993_v48  ;;  %v4062_v44 = vld [vmem:[%s5636_s13 + $0x5a0] ss:$20 sps:$4 sm:$0xff]   ;;  %v4065_v48 = vld [vmem:[%s5636_s13 + $0x5a8] ss:$20 sps:$4 sm:$0xff]   ;;  %4142 = vpow2.f32 %v1470_v34 }
 0x73e   :  { %2816 = vmatprep.subr.bf16.mxu1 %v3998_v42  ;;  %2939 = vmatprep.subr.bf16.mxu0 %v4001_v50  ;;  %v4070_v42 = vld [vmem:[%s5636_s13 + $0x5cc] ss:$20 sps:$4 sm:$0xff]   ;;  %v4073_v50 = vld [vmem:[%s5636_s13 + $0x5d4] ss:$20 sps:$4 sm:$0xff]  }
 0x73f   :  { %v4125_v34 = vld [vmem:[%s5636_s13 + $0x628] ss:$20 sps:$4 sm:$0xff]  }
 0x741   :  { %2817 = vmatpush1.bf16.msra.mxu1 %v3996_v51  ;;  %2940 = vmatpush1.bf16.msra.mxu0 %v3999_v52  ;;  %v4068_v51 = vld [vmem:[%s5636_s13 + $0x5c8] ss:$20 sps:$4 sm:$0xff]   ;;  %v4071_v52 = vld [vmem:[%s5636_s13 + $0x5d0] ss:$20 sps:$4 sm:$0xff]  }
 0x742   :  { %2818 = vmatprep.subr.bf16.mxu1 %v4004_v56  ;;  %2941 = vmatprep.subr.bf16.mxu0 %v4007_v53  ;;  %v4076_v56 = vld [vmem:[%s5636_s13 + $0x5f4] ss:$20 sps:$4 sm:$0xff]   ;;  %v4079_v53 = vld [vmem:[%s5636_s13 + $0x5fc] ss:$20 sps:$4 sm:$0xff]  }
 0x745   :  { %2819 = vmatpush1.bf16.msra.mxu1 %v4002_v38  ;;  %2942 = vmatpush1.bf16.msra.mxu0 %v4005_v54  ;;  %v4074_v38 = vld [vmem:[%s5636_s13 + $0x5f0] ss:$20 sps:$4 sm:$0xff]   ;;  %v4077_v54 = vld [vmem:[%s5636_s13 + $0x5f8] ss:$20 sps:$4 sm:$0xff]  }
 0x746   :  { %2820 = vmatprep.subr.bf16.mxu1 %v4010_v58  ;;  %2943 = vmatprep.subr.bf16.mxu0 %v4013_v62  ;;  %v4082_v58 = vld [vmem:[%s5636_s13 + $0x61c] ss:$20 sps:$4 sm:$0xff]   ;;  %v4085_v62 = vld [vmem:[%s5636_s13 + $0x624] ss:$20 sps:$4 sm:$0xff]  }
 0x749   :  { %2821 = vmatpush1.bf16.msra.mxu1 %v4008_v3  ;;  %2944 = vmatpush1.bf16.msra.mxu0 %v4011_v4  ;;  %v4083_v3 = vld [vmem:[%s5636_s13 + $0x620] ss:$20 sps:$4 sm:$0xff]   ;;  %v4086_v4 = vld [vmem:[%s5636_s13 + $0x150] ss:$20 sps:$4 sm:$0xff]  }
 0x74a   :  { %2822 = vmatprep.subr.bf16.mxu1 %v4016_v6  ;;  %2945 = vmatprep.subr.bf16.mxu0 %v4019_v61  ;;  %v4087_v6 = vld [vmem:[%s5636_s13 + $0x3d0] ss:$20 sps:$4 sm:$0xff]   ;;  %v5470_v61 = vpop.eup %4142 }
 0x74d   :  { %2823 = vmatpush1.bf16.msra.mxu1 %v4014_v18  ;;  %2946 = vmatpush1.bf16.msra.mxu0 %v4017_v9  ;;  %v5477_v18 = vpack.c.bf16 %v5470_v61, %v5470_v61  ;;  %v4089_v9 = vld [vmem:[%s5636_s13 + $0x290] ss:$20 sps:$4 sm:$0xff]  }
 0x74e   :  { %2824 = vmatprep.subr.bf16.mxu1 %v4022_v41  ;;  %2947 = vmatprep.subr.bf16.mxu0 %v4025_v11  ;;  %v4090_v41 = vld [vmem:[%s5636_s13 + $0x178] ss:$20 sps:$4 sm:$0xff]  }
 0x74f   :  { %v4091_v11 = vld [vmem:[%s5636_s13 + $0x3f8] ss:$20 sps:$4 sm:$0xff]  }
 0x751   :  { %2825 = vmatpush1.bf16.msra.mxu1 %v4020_v12  ;;  %2948 = vmatpush1.bf16.msra.mxu0 %v4023_v13  ;;  %v4092_v12 = vld [vmem:[%s5636_s13 + $0x38] ss:$20 sps:$4 sm:$0xff]  }
 0x752   :  { %2826 = vmatprep.subr.bf16.mxu1 %v4028_v14  ;;  %2949 = vmatprep.subr.bf16.mxu0 %v4031_v19  ;;  %v4093_v13 = vld [vmem:[%s5636_s13 + $0x2b8] ss:$20 sps:$4 sm:$0xff]   ;;  %v4094_v14 = vld [vmem:[%s5636_s13 + $0x1a0] ss:$20 sps:$4 sm:$0xff]  }
 0x753   :  { %v4096_v19 = vld [vmem:[%s5636_s13 + $0x60] ss:$20 sps:$4 sm:$0xff]  }
 0x755   :  { %2827 = vmatpush1.bf16.msra.mxu1 %v4026_v22  ;;  %2950 = vmatpush1.bf16.msra.mxu0 %v4029_v23  ;;  %v4098_v22 = vld [vmem:[%s5636_s13 + $0x1c8] ss:$20 sps:$4 sm:$0xff]  }
 0x756   :  { %2828 = vmatprep.subr.bf16.mxu1 %v4034_v20  ;;  %2951 = vmatprep.subr.bf16.mxu0 %v4037_v24  ;;  %v4099_v23 = vld [vmem:[%s5636_s13 + $0x448] ss:$20 sps:$4 sm:$0xff]  }
 0x757   :  { %v4100_v20 = vld [vmem:[%s5636_s13 + $0x88] ss:$20 sps:$4 sm:$0xff]  }
 0x758   :  { %v4101_v24 = vld [vmem:[%s5636_s13 + $0x308] ss:$20 sps:$4 sm:$0xff]  }
 0x759   :  { %2829 = vmatpush1.bf16.msra.mxu1 %v4032_v26  ;;  %2952 = vmatpush1.bf16.msra.mxu0 %v4035_v46  ;;  %v4102_v26 = vld [vmem:[%s5636_s13 + $0x1f0] ss:$20 sps:$4 sm:$0xff]  }
 0x75a   :  { %2839 = vmatprep.subr.bf16.mxu1 %v4040_v31  ;;  %2962 = vmatprep.subr.bf16.mxu0 %v4043_v16  ;;  %v4103_v46 = vld [vmem:[%s5636_s13 + $0x470] ss:$20 sps:$4 sm:$0xff]  }
 0x75b   :  { %v4104_v31 = vld [vmem:[%s5636_s13 + $0xb0] ss:$20 sps:$4 sm:$0xff]  }
 0x75c   :  { %2831 = vmatmul.mubr.bf16.vlgmr.msra.gmra.mrb[20].mxu1 %v5372_v21  ;;  %2954 = vmatmul.mubr.bf16.vlgmr.msra.gmra.mrb[28].mxu0 %v5372_v21  ;;  %v4105_v16 = vld [vmem:[%s5636_s13 + $0x330] ss:$20 sps:$4 sm:$0xff]  }
 0x75d   :  { %2840 = vmatpush1.bf16.msra.mxu1 %v4038_v29  ;;  %2963 = vmatpush1.bf16.msra.mxu0 %v4041_v57  ;;  %v4106_v29 = vld [vmem:[%s5636_s13 + $0x218] ss:$20 sps:$4 sm:$0xff]  }
 0x75e   :  { %2841 = vmatprep.subr.bf16.mxu1 %v4046_v47  ;;  %2964 = vmatprep.subr.bf16.mxu0 %v4049_v30  ;;  %v4107_v57 = vld [vmem:[%s5636_s13 + $0x498] ss:$20 sps:$4 sm:$0xff]  }
 0x75f   :  { %2871 = vmatprep.mubr.bf16.mxu1 %v4227_v0  ;;  %2994 = vmatprep.mubr.bf16.mxu0 %v4227_v0  ;;  %v4061_v0 = vld [vmem:[%s5636_s13 + $0x584] ss:$20 sps:$4 sm:$0xff]  }
 0x760   :  { %v4108_v47 = vld [vmem:[%s5636_s13 + $0xd8] ss:$20 sps:$4 sm:$0xff]  }
 0x761   :  { %2842 = vmatpush1.bf16.msra.mxu1 %v4044_v59  ;;  %2965 = vmatpush1.bf16.msra.mxu0 %v4047_v15  ;;  %v4109_v30 = vld [vmem:[%s5636_s13 + $0x358] ss:$20 sps:$4 sm:$0xff]   ;;  %v4110_v59 = vld [vmem:[%s5636_s13 + $0x240] ss:$20 sps:$4 sm:$0xff]  }
 0x762   :  { %2843 = vmatprep.subr.bf16.mxu1 %v4052_v28  ;;  %2966 = vmatprep.subr.bf16.mxu0 %v4055_v33  ;;  %v4111_v15 = vld [vmem:[%s5636_s13 + $0x4c0] ss:$20 sps:$4 sm:$0xff]  }
 0x763   :  { %v4112_v28 = vld [vmem:[%s5636_s13 + $0x100] ss:$20 sps:$4 sm:$0xff]  }
 0x764   :  { %v4113_v33 = vld [vmem:[%s5636_s13 + $0x380] ss:$20 sps:$4 sm:$0xff]  }
 0x765   :  { %2844 = vmatpush1.bf16.msra.mxu1 %v4050_v25  ;;  %2967 = vmatpush1.bf16.msra.mxu0 %v4053_v35  ;;  %v4114_v25 = vld [vmem:[%s5636_s13 + $0x268] ss:$20 sps:$4 sm:$0xff]  }
 0x766   :  { %2845 = vmatprep.subr.bf16.mxu1 %v4058_v27  ;;  %2968 = vmatprep.subr.bf16.mxu0 %v4061_v0  ;;  %v4115_v35 = vld [vmem:[%s5636_s13 + $0x4e8] ss:$20 sps:$4 sm:$0xff]  }
 0x767   :  { %v4116_v27 = vld [vmem:[%s5636_s13 + $0x128] ss:$20 sps:$4 sm:$0xff]  }
 0x768   :  { %v4117_v0 = vld [vmem:[%s5636_s13 + $0x3a8] ss:$20 sps:$4 sm:$0xff]  }
 0x769   :  { %2846 = vmatpush1.bf16.msra.mxu1 %v4056_v37  ;;  %2969 = vmatpush1.bf16.msra.mxu0 %v4059_v17  ;;  %v4119_v37 = vld [vmem:[%s5636_s13 + $0x538] ss:$20 sps:$4 sm:$0xff]   ;;  %v4120_v17 = vld [vmem:[%s5636_s13 + $0x560] ss:$20 sps:$4 sm:$0xff]  }
 0x76a   :  { %2847 = vmatprep.subr.bf16.mxu1 %v4064_v43  ;;  %2970 = vmatprep.subr.bf16.mxu0 %v4067_v39  ;;  %v4123_v43 = vld [vmem:[%s5636_s13 + $0x5d8] ss:$20 sps:$4 sm:$0xff]   ;;  %v4124_v39 = vld [vmem:[%s5636_s13 + $0x600] ss:$20 sps:$4 sm:$0xff]  }
 0x76d   :  { %2848 = vmatpush1.bf16.msra.mxu1 %v4062_v44  ;;  %2971 = vmatpush1.bf16.msra.mxu0 %v4065_v48 }
 0x76e   :  { %2849 = vmatprep.subr.bf16.mxu1 %v4070_v42  ;;  %2972 = vmatprep.subr.bf16.mxu0 %v4073_v50 }
 0x771   :  { %2850 = vmatpush1.bf16.msra.mxu1 %v4068_v51  ;;  %2973 = vmatpush1.bf16.msra.mxu0 %v4071_v52 }
 0x772   :  { %2851 = vmatprep.subr.bf16.mxu1 %v4076_v56  ;;  %2974 = vmatprep.subr.bf16.mxu0 %v4079_v53 }
 0x775   :  { %2852 = vmatpush1.bf16.msra.mxu1 %v4074_v38  ;;  %2975 = vmatpush1.bf16.msra.mxu0 %v4077_v54 }
 0x776   :  { %2853 = vmatprep.subr.bf16.mxu1 %v4082_v58  ;;  %2976 = vmatprep.subr.bf16.mxu0 %v4085_v62 }
 0x779   :  { %2854 = vmatpush1.bf16.msra.mxu1 %v4080_v1  ;;  %2977 = vmatpush1.bf16.msra.mxu0 %v4083_v3 }
 0x77a   :  { %3585 = vmatprep.subr.bf16.mxu1 %v4086_v4  ;;  %3607 = vmatprep.subr.bf16.mxu0 %v4087_v6 }
 0x77c   :  { %2872 = vmatmul.mubr.bf16.vlgmr.msra.gmra.mrb[20].mxu1 %v5477_v18  ;;  %2995 = vmatmul.mubr.bf16.vlgmr.msra.gmra.mrb[28].mxu0 %v5477_v18 }
 0x77d   :  { %3586 = vmatpush3.bf16.msra.mxu1 %v4088_v7  ;;  %3035 = vmatprep.mubr.bf16.mxu1 %v5146_v2  ;;  %v4095_v2 = vld [vmem:[%s5636_s13 + $0x420] ss:$20 sps:$4 sm:$0xff]  }
 0x77e   :  { %3608 = vmatpush3.bf16.msra.mxu0 %v4089_v9  ;;  %3075 = vmatprep.mubr.bf16.mxu0 %v5169_v8  ;;  %v4097_v8 = vld [vmem:[%s5636_s13 + $0x2e0] ss:$20 sps:$4 sm:$0xff]  }
 0x77f   :  { %3587 = vmatprep.subr.bf16.mxu1 %v4090_v41  ;;  %3609 = vmatprep.subr.bf16.mxu0 %v4091_v11 }
 0x781   :  { %3588 = vmatpush3.bf16.msra.mxu1 %v4092_v12 }
 0x782   :  { %3610 = vmatpush3.bf16.msra.mxu0 %v4093_v13  ;;  %3589 = vmatprep.subr.bf16.mxu1 %v4094_v14 }
 0x783   :  { %3611 = vmatprep.subr.bf16.mxu0 %v4095_v2 }
 0x785   :  { %3590 = vmatpush3.bf16.msra.mxu1 %v4096_v19 }
 0x786   :  { %3612 = vmatpush3.bf16.msra.mxu0 %v4097_v8  ;;  %3591 = vmatprep.subr.bf16.mxu1 %v4098_v22 }
 0x787   :  { %3613 = vmatprep.subr.bf16.mxu0 %v4099_v23 }
 0x789   :  { %3592 = vmatpush3.bf16.msra.mxu1 %v4100_v20 }
 0x78a   :  { %3614 = vmatpush3.bf16.msra.mxu0 %v4101_v24  ;;  %3593 = vmatprep.subr.bf16.mxu1 %v4102_v26 }
 0x78b   :  { %3615 = vmatprep.subr.bf16.mxu0 %v4103_v46 }
 0x78d   :  { %3594 = vmatpush3.bf16.msra.mxu1 %v4104_v31 }
 0x78e   :  { %3616 = vmatpush3.bf16.msra.mxu0 %v4105_v16  ;;  %3595 = vmatprep.subr.bf16.mxu1 %v4106_v29 }
 0x78f   :  { %3617 = vmatprep.subr.bf16.mxu0 %v4107_v57 }
 0x791   :  { %3596 = vmatpush3.bf16.msra.mxu1 %v4108_v47 }
 0x792   :  { %3618 = vmatpush3.bf16.msra.mxu0 %v4109_v30  ;;  %3597 = vmatprep.subr.bf16.mxu1 %v4110_v59 }
 0x793   :  { %3619 = vmatprep.subr.bf16.mxu0 %v4111_v15 }
 0x795   :  { %3598 = vmatpush3.bf16.msra.mxu1 %v4112_v28 }
 0x796   :  { %3620 = vmatpush3.bf16.msra.mxu0 %v4113_v33  ;;  %3599 = vmatprep.subr.bf16.mxu1 %v4114_v25 }
 0x797   :  { %3621 = vmatprep.subr.bf16.mxu0 %v4115_v35 }
 0x799   :  { %3600 = vmatpush3.bf16.msra.mxu1 %v4116_v27 }
 0x79a   :  { %3622 = vmatpush3.bf16.msra.mxu0 %v4117_v0  ;;  %3678 = vmatprep.subr.bf16.mxu1 %v4230_v40 }
 0x79c   :  { %3036 = vmatmul.mubr.bf16.vlgmr.msra.gmra.mrb[24].mxu1 %v5142_v63  ;;  %v4121_v63 = vld [vmem:[%s5636_s13 + $0x588] ss:$20 sps:$4 sm:$0xff]  }
 0x79d   :  { %3076 = vmatmul.mubr.bf16.vlgmr.msra.gmra.mrb[32].mxu0 %v5372_v21  ;;  %3679 = vmatpush3.bf16.msra.mxu1 %v4118_v36  ;;  %v4122_v21 = vld [vmem:[%s5636_s13 + $0x5b0] ss:$20 sps:$4 sm:$0xff]  }
 0x79e   :  { %3680 = vmatprep.subr.bf16.mxu1 %v4230_v40  ;;  %3694 = vmatprep.mubr.msk.bf16.mxu1 %vm4229_vm1, %v4230_v40 }
 0x7a1   :  { %3681 = vmatpush3.bf16.msra.mxu1 %v4119_v37 }
 0x7a2   :  { %3682 = vmatprep.subr.bf16.mxu1 %v4230_v40 }
 0x7a5   :  { %3683 = vmatpush3.bf16.msra.mxu1 %v4120_v17 }
 0x7a6   :  { %3684 = vmatprep.subr.bf16.mxu1 %v4230_v40 }
 0x7a9   :  { %3685 = vmatpush3.bf16.msra.mxu1 %v4121_v63 }
 0x7aa   :  { %3686 = vmatprep.subr.bf16.mxu1 %v4230_v40 }
 0x7ad   :  { %3687 = vmatpush3.bf16.msra.mxu1 %v4122_v21 }
 0x7ae   :  { %3688 = vmatprep.subr.bf16.mxu1 %v4230_v40 }
 0x7b1   :  { %3689 = vmatpush3.bf16.msra.mxu1 %v4123_v43 }
 0x7b2   :  { %3690 = vmatprep.subr.bf16.mxu1 %v4230_v40 }
 0x7b5   :  { %3691 = vmatpush3.bf16.msra.mxu1 %v4124_v39 }
 0x7b6   :  { %3692 = vmatprep.subr.bf16.mxu1 %v4230_v40 }
 0x7b9   :  { %3693 = vmatpush3.bf16.msra.mxu1 %v4125_v34 }
 0x7bc   :  { %3695 = vmatmul.mubr.bf16.vlgmr.msra.gmra.mrb[28].mxu1 %v5477_v18 }
 0x84f   :  { %v2873_v44 = vpop.f32.mrb[20].mxu1  ;;  %v2996_v48 = vpop.f32.mrb[28].mxu0 }
 0x850   :  { %v3123_v42 = vmax.f32 %v2873_v44, 1e-30  ;;  %v3125_v50 = vmax.f32 %v2996_v48, 1e-30  ;;  %v2875_v51 = vpop.f32.mrb[21].mxu1  ;;  %v2998_v52 = vpop.f32.mrb[29].mxu0 }
 0x851   :  { %v3124_v56 = vmax.f32 %v2875_v51, 1e-30  ;;  %v3126_v53 = vmax.f32 %v2998_v52, 1e-30  ;;  %v2877_v38 = vpop.f32.mrb[22].mxu1  ;;  %v3000_v54 = vpop.f32.mrb[30].mxu0 }
 0x852   :  { %4144 = vrcp.f32 %v3123_v42  ;;  %v2878_v58 = vpop.f32.mrb[23].mxu1  ;;  %v3001_v62 = vpop.f32.mrb[31].mxu0 }
 0x853   :  { %4146 = vrcp.f32 %v3125_v50 }
 0x854   :  { %4148 = vrcp.f32 %v3124_v56 }
 0x855   :  { %4150 = vrcp.f32 %v3126_v53 }
 0x85c   :  { %v4145_v40 = vpop.eup %4144 }
 0x85d   :  { %v4147_v1 = vpop.eup %4146  ;;  %v3129_v3 = vmul.f32 %v4145_v40, %v5136_v32 }
 0x85e   :  { %v4149_v4 = vpop.eup %4148  ;;  %v3133_v6 = vmul.f32 %v4147_v1, %v5362_v55 }
 0x85f   :  { %v4151_v7 = vpop.eup %4150  ;;  %v3131_v18 = vmul.f32 %v4149_v4, %v5138_v60 }
 0x860   :  { %v3135_v9 = vmul.f32 %v4151_v7, %v5154_v5 }
 0x861   :  { %v3187_v41 = vcombine.low %v3129_v3, %v3131_v18 }
 0x862   :  { %v3188_v11 = vcombine.low %v3133_v6, %v3135_v9 }
 0x863   :  { %v3195_v12 = vrot.slane %v3187_v41, %v5172_v10 }
 0x864   :  { %v3202_v13 = vrot.slane %v3188_v11, %v5172_v10 }
 0x866   :  { %v3203_v14 = vcombine.low %v3195_v12, %v3202_v13 }
 0x868   :  { %3223 = vst [vmem:[%s5637_s14] sm:$0xff] %v3203_v14 }
 0x86f   :  { %v3601_v32 = vpop.f32.mrb[24].mxu1 }
 0x870   :  { %v3623_v2 = vpop.f32.mrb[32].mxu0  ;;  %v3602_v19 = vpop.f32.mrb[25].mxu1 }
 0x871   :  { %v3603_v55 = vadd.f32 %v3602_v19, %v3601_v32  ;;  %v3624_v8 = vpop.f32.mrb[33].mxu0  ;;  %v3604_v22 = vpop.f32.mrb[26].mxu1 }
 0x872   :  { %v3625_v60 = vadd.f32 %v3624_v8, %v3623_v2  ;;  %v3626_v23 = vpop.f32.mrb[34].mxu0  ;;  %v3605_v5 = vpop.f32.mrb[27].mxu1 }
 0x873   :  { %v3627_v20 = vpop.f32.mrb[35].mxu0 }
 0x874   :  { %v3078_v24 = vadd.f32 %v3625_v60, %v3603_v55 }
 0x88f   :  { %v3117_v26 = vpop.f32.mrb[28].mxu1 }
 0x890   :  { %v3118_v46 = vadd.f32 %v3117_v26, %v3078_v24  ;;  %v3696_v31 = vpop.f32.mrb[29].mxu1 }
 0x891   :  { %v3120_v16 = vpop.f32.mrb[30].mxu1 }
 0x892   :  { %v3127_v29 = vmax.f32 %v3118_v46, 1e-30  ;;  %v3697_v57 = vpop.f32.mrb[31].mxu1 }
 0x894   :  { %4152 = vrcp.f32 %v3127_v29 }
 0x89e   :  { %v4153_v47 = vpop.eup %4152 }
 0x89f   :  { %v3137_v30 = vmul.f32 %v4153_v47, %v5470_v61 }
 0x8a1   :  { %v3204_v59 = vcombine.low %v3137_v30, %v5044_v45 }
 0x8a3   :  { %v3212_v15 = vrot.slane %v3204_v59, %v5172_v10 }
 0x8a5   :  { %v3220_v28 = vcombine.low %v3212_v15, %v5190_v49 }
 0x8a7   :  { %3224 = vst [vmem:[%s5637_s14 + $0x8] sm:$0xff] %v3220_v28 }
 0x8a8   :  { %3229 = vsyncpa [#allocation3], 1 }
 0x8a9   :  { %3230 = vsyncpa [#allocation5], 1 }

</bundles_post_ra>
